<compile_context>
chip_gen: v6e
topology: v6e:2x2x1
jax: 0.10.0
libtpu: 0.0.40
codegen_flags: <defaults>
</compile_context>

<pallas_src>
import math
import functools

import jax
import jax.numpy as jnp
from jax.experimental import pallas as pl
from jax.experimental.pallas import tpu as pltpu


def _leaky_relu(v, slope=0.2):
    return jnp.where(v > 0, v, slope * v)


def _disres_kernel(x_ref, e_ref, b1_ref, w2_ref, b2_ref, wsc_ref,
                   out_ref, zpad_ref, hpad_ref,
                   *, H, W, Cin, Cout, Nb, learned_sc):
    H2, W2 = H // 2, W // 2
    M2 = Nb * H2 * W2
    f32 = jnp.float32
    bf16 = jnp.bfloat16

    # ---- activate the input once (f32 on the VPU), build zero-padded copy ----
    xv = x_ref[...]                                           # (Nb, H, W, Cin)
    zpad_ref[:, 1:H + 1, 1:W + 1, :] = _leaky_relu(xv)
    zpad_ref[:, 0:1, :, :] = jnp.zeros((Nb, 1, W + 2, Cin), f32)
    zpad_ref[:, H + 1:H + 2, :, :] = jnp.zeros((Nb, 1, W + 2, Cin), f32)
    zpad_ref[:, :, 0:1, :] = jnp.zeros((Nb, H + 2, 1, Cin), f32)
    zpad_ref[:, :, W + 1:W + 2, :] = jnp.zeros((Nb, H + 2, 1, Cin), f32)

    # ---- conv1 (3x3, pad 1) fused with avg_pool2d(2): a 4x4 / stride-2 conv,
    #      computed as ONE im2col matmul with K = 16*Cin ----
    taps1 = []
    for u in range(4):
        for v in range(4):
            taps1.append(zpad_ref[:, pl.ds(u, H2, 2), pl.ds(v, W2, 2), :])
    pat1 = jnp.concatenate(taps1, axis=-1).reshape(M2, 16 * Cin)
    h = jnp.dot(pat1.astype(bf16), e_ref[...], preferred_element_type=f32)
    h = _leaky_relu(h + b1_ref[...])                          # (M2, Cin), f32

    # ---- zero-padded buffer for conv2 (border + interior written, no full fill) ----
    hpad_ref[:, 1:H2 + 1, 1:W2 + 1, :] = h.reshape(Nb, H2, W2, Cin)
    hpad_ref[:, 0:1, :, :] = jnp.zeros((Nb, 1, W2 + 2, Cin), f32)
    hpad_ref[:, H2 + 1:H2 + 2, :, :] = jnp.zeros((Nb, 1, W2 + 2, Cin), f32)
    hpad_ref[:, :, 0:1, :] = jnp.zeros((Nb, H2 + 2, 1, Cin), f32)
    hpad_ref[:, :, W2 + 1:W2 + 2, :] = jnp.zeros((Nb, H2 + 2, 1, Cin), f32)

    # ---- conv2 (3x3, pad 1) as ONE im2col matmul with K = 9*Cin ----
    taps2 = []
    for dy in range(3):
        for dx in range(3):
            taps2.append(hpad_ref[:, dy:dy + H2, dx:dx + W2, :])
    pat2 = jnp.concatenate(taps2, axis=-1).reshape(M2, 9 * Cin)
    y = jnp.dot(pat2.astype(bf16), w2_ref[...], preferred_element_type=f32)
    y = y + b2_ref[...]                                       # (M2, Cout)

    # ---- shortcut: average-pool FIRST (4 strided reads), then 1x1 conv ----
    s = (x_ref[:, pl.ds(0, H2, 2), pl.ds(0, W2, 2), :] +
         x_ref[:, pl.ds(0, H2, 2), pl.ds(1, W2, 2), :] +
         x_ref[:, pl.ds(1, H2, 2), pl.ds(0, W2, 2), :] +
         x_ref[:, pl.ds(1, H2, 2), pl.ds(1, W2, 2), :]) * 0.25
    s = s.reshape(M2, Cin)
    if learned_sc:
        s = jnp.dot(s.astype(bf16), wsc_ref[...], preferred_element_type=f32)

    out = (y + s) * (1.0 / math.sqrt(2.0))
    out_ref[...] = out.reshape(Nb, H2 * W2, Cout).astype(out_ref.dtype)


def _fused_conv1_pool_weights(w1):
    """Fold conv1 (3x3, pad 1) followed by 2x2 avg-pool into the weights of an
    equivalent 4x4 / stride-2 conv, flattened to (16*Cin, Cin) in bf16."""
    Cin = w1.shape[0]
    w1_t = jnp.transpose(w1, (2, 3, 1, 0)).astype(jnp.float32)   # (3, 3, Cin, Cin)
    sel = {0: (0,), 1: (0, 1), 2: (1, 2), 3: (2,)}
    rows = []
    for u in range(4):
        cols = []
        for v in range(4):
            acc = jnp.zeros((Cin, Cin), jnp.float32)
            for dy in sel[u]:
                for dx in sel[v]:
                    acc = acc + w1_t[dy, dx]
            cols.append(0.25 * acc)
        rows.append(jnp.stack(cols))
    eff = jnp.stack(rows)                                        # (4, 4, Cin, Cin)
    return eff.reshape(16 * Cin, Cin).astype(jnp.bfloat16)


def disres_pallas(x_nchw, w1, b1, w2, b2, wsc=None, *, batch_block=None):
    """DisRes forward.  x_nchw: (N, Cin, H, W).  Weights in PyTorch layout:
    w1 (Cin, Cin, 3, 3), b1 (Cin,), w2 (Cout, Cin, 3, 3), b2 (Cout,),
    wsc (Cout, Cin, 1, 1) or None (when dim_in == dim_out)."""
    N, Cin, H, W = x_nchw.shape
    Cout = w2.shape[0]
    assert H % 2 == 0 and W % 2 == 0, "avg_pool2d(2) requires even H and W"
    H2, W2 = H // 2, W // 2
    learned_sc = wsc is not None
    if not learned_sc:
        assert Cin == Cout

    nb = batch_block
    if nb is None:
        nb = 1
        for cand in (8, 4, 2):                  # batch images per step, but keep
            if N % cand == 0 and N // cand >= 2:  # >=2 grid steps for megacore
                nb = cand
                break
    assert N % nb == 0

    # NCHW -> NHWC (channels on lanes); no HBM-side spatial padding.
    x_nhwc = jnp.transpose(x_nchw, (0, 2, 3, 1)).astype(jnp.float32)

    e_flat = _fused_conv1_pool_weights(w1)                       # (16*Cin, Cin) bf16
    w2_flat = (jnp.transpose(w2, (2, 3, 1, 0))
               .reshape(9 * Cin, Cout).astype(jnp.bfloat16))     # (9*Cin, Cout) bf16
    b1_k = b1.reshape(1, Cin).astype(jnp.float32)
    b2_k = b2.reshape(1, Cout).astype(jnp.float32)
    if learned_sc:
        wsc_k = jnp.transpose(wsc[:, :, 0, 0], (1, 0)).astype(jnp.bfloat16)
    else:
        wsc_k = jnp.eye(Cin, dtype=jnp.bfloat16)                 # unused placeholder

    kernel = functools.partial(_disres_kernel, H=H, W=W, Cin=Cin, Cout=Cout,
                               Nb=nb, learned_sc=learned_sc)

    out_flat = pl.pallas_call(
        kernel,
        out_shape=jax.ShapeDtypeStruct((N, H2 * W2, Cout), jnp.float32),
        grid_spec=pltpu.PrefetchScalarGridSpec(
            num_scalar_prefetch=0,
            grid=(N // nb,),
            in_specs=[
                pl.BlockSpec((nb, H, W, Cin), lambda b: (b, 0, 0, 0)),
                pl.BlockSpec((16 * Cin, Cin), lambda b: (0, 0)),
                pl.BlockSpec((1, Cin), lambda b: (0, 0)),
                pl.BlockSpec((9 * Cin, Cout), lambda b: (0, 0)),
                pl.BlockSpec((1, Cout), lambda b: (0, 0)),
                pl.BlockSpec(wsc_k.shape, lambda b: (0, 0)),
            ],
            out_specs=pl.BlockSpec((nb, H2 * W2, Cout), lambda b: (b, 0, 0)),
            scratch_shapes=[
                pltpu.VMEM((nb, H + 2, W + 2, Cin), jnp.float32),    # act(x), padded
                pltpu.VMEM((nb, H2 + 2, W2 + 2, Cin), jnp.float32),  # act(pool), padded
            ],
        ),
        compiler_params=pltpu.CompilerParams(
            dimension_semantics=("parallel",)),
    )(x_nhwc, e_flat, b1_k, w2_flat, b2_k, wsc_k)

    out = out_flat.reshape(N, H2, W2, Cout)
    return jnp.transpose(out, (0, 3, 1, 2))                      # back to NCHW


def _reference(x, w1, b1, w2, b2, wsc):
    """Pure-JAX NCHW reference matching the PyTorch module (f32, HIGHEST)."""
    def lrelu(v):
        return jnp.where(v > 0, v, 0.2 * v)

    dn = ('NCHW', 'OIHW', 'NCHW')
    prec = jax.lax.Precision.HIGHEST

    def conv(v, w, b, pad):
        o = jax.lax.conv_general_dilated(v, w, (1, 1), [(pad, pad), (pad, pad)],
                                         dimension_numbers=dn, precision=prec)
        if b is not None:
            o = o + b[None, :, None, None]
        return o

    def pool2(v):
        n, c, hh, ww = v.shape
        return v.reshape(n, c, hh // 2, 2, ww // 2, 2).mean(axis=(3, 5))

    sc = conv(x, wsc, None, 0) if wsc is not None else x
    sc = pool2(sc)
    h = lrelu(x)
    h = conv(h, w1, b1, 1)
    h = pool2(h)
    h = lrelu(h)
    h = conv(h, w2, b2, 1)
    return (h + sc) / math.sqrt(2.0)


if __name__ == "__main__":
    N, Cin, Cout, H, W = 2, 8, 16, 16, 16   # dim_in != dim_out -> learned_sc path
    key = jax.random.PRNGKey(0)
    kx, k1, k2, k3, k4, k5 = jax.random.split(key, 6)

    x = jax.random.normal(kx, (N, Cin, H, W), jnp.float32)
    w1 = 0.1 * jax.random.normal(k1, (Cin, Cin, 3, 3), jnp.float32)
    b1 = 0.1 * jax.random.normal(k2, (Cin,), jnp.float32)
    w2 = 0.1 * jax.random.normal(k3, (Cout, Cin, 3, 3), jnp.float32)
    b2 = 0.1 * jax.random.normal(k4, (Cout,), jnp.float32)
    wsc = 0.1 * jax.random.normal(k5, (Cout, Cin, 1, 1), jnp.float32)

    out = disres_pallas(x, w1, b1, w2, b2, wsc)
    out = jax.block_until_ready(out)

    assert out.shape == (N, Cout, H // 2, W // 2), out.shape
    ref = _reference(x, w1, b1, w2, b2, wsc)
    # bf16 MXU operands with f32 accumulation -> compare with a bf16-level tolerance.
    if not jnp.allclose(out, ref, rtol=2e-2, atol=2e-2):
        max_err = float(jnp.max(jnp.abs(out - ref)))
        raise AssertionError(f"Pallas output mismatch, max abs err = {max_err}")

    print("KERNEL_OK")
</pallas_src>

<mosaic_0001>
module attributes {stable_mosaic.version = 11 : i64} {
  func.func @_disres_kernel(%arg0: i32, %arg1: memref<1x16x16x8xf32, #tpu.memory_space<vmem>>, %arg2: memref<128x8xbf16, #tpu.memory_space<vmem>>, %arg3: memref<1x8xf32, #tpu.memory_space<vmem>>, %arg4: memref<72x16xbf16, #tpu.memory_space<vmem>>, %arg5: memref<1x16xf32, #tpu.memory_space<vmem>>, %arg6: memref<8x16xbf16, #tpu.memory_space<vmem>>, %arg7: memref<1x64x16xf32, #tpu.memory_space<vmem>>, %arg8: memref<1x18x18x8xf32, #tpu.memory_space<vmem>>, %arg9: memref<1x10x10x8xf32, #tpu.memory_space<vmem>>) attributes {dimension_semantics = [#tpu.dimension_semantics<parallel>], iteration_bounds = array<i64: 2>, scalar_prefetch = 0 : i64, scratch_operands = 2 : i64, tpu.core_type = #tpu.core_type<tc>, window_params = [{transform_indices = @transform_0, window_bounds = array<i64: 1, 16, 16, 8>}, {pipeline_mode = #tpu.pipeline_mode<synchronous>, transform_indices = @transform_1, window_bounds = array<i64: 128, 8>}, {pipeline_mode = #tpu.pipeline_mode<synchronous>, transform_indices = @transform_2, window_bounds = array<i64: 1, 8>}, {pipeline_mode = #tpu.pipeline_mode<synchronous>, transform_indices = @transform_3, window_bounds = array<i64: 72, 16>}, {pipeline_mode = #tpu.pipeline_mode<synchronous>, transform_indices = @transform_4, window_bounds = array<i64: 1, 16>}, {pipeline_mode = #tpu.pipeline_mode<synchronous>, transform_indices = @transform_5, window_bounds = array<i64: 8, 16>}, {transform_indices = @transform_6, window_bounds = array<i64: 1, 64, 16>}]} {
    %c0 = arith.constant 0 : index
    %c0_0 = arith.constant 0 : index
    %c0_1 = arith.constant 0 : index
    %c0_2 = arith.constant 0 : index
    %0 = vector.load %arg1[%c0, %c0_0, %c0_1, %c0_2] : memref<1x16x16x8xf32, #tpu.memory_space<vmem>>, vector<1x16x16x8xf32>
    %cst = arith.constant 0.000000e+00 : f32
    %1 = vector.broadcast %cst : f32 to vector<1x16x16x8xf32>
    %2 = arith.cmpf ogt, %0, %1 : vector<1x16x16x8xf32>
    %cst_3 = arith.constant 2.000000e-01 : f32
    %3 = vector.broadcast %cst_3 : f32 to vector<1x16x16x8xf32>
    %4 = arith.mulf %3, %0 : vector<1x16x16x8xf32>
    %5 = arith.select %2, %0, %4 : vector<1x16x16x8xi1>, vector<1x16x16x8xf32>
    %c0_4 = arith.constant 0 : index
    %c1 = arith.constant 1 : index
    %c1_5 = arith.constant 1 : index
    %c0_6 = arith.constant 0 : index
    %6 = vector.load %arg8[%c0_4, %c1, %c1_5, %c0_6] : memref<1x18x18x8xf32, #tpu.memory_space<vmem>>, vector<1x16x16x8xf32>
    tpu.vector_store %arg8[%c0_4, %c1, %c1_5, %c0_6], %5 {strides = array<i32>} : memref<1x18x18x8xf32, #tpu.memory_space<vmem>>, vector<1x16x16x8xf32>,
    %cst_7 = arith.constant 0.000000e+00 : f32
    %7 = vector.broadcast %cst_7 : f32 to vector<1x1x18x8xf32>
    %c0_8 = arith.constant 0 : index
    %c0_9 = arith.constant 0 : index
    %c0_10 = arith.constant 0 : index
    %c0_11 = arith.constant 0 : index
    %8 = vector.load %arg8[%c0_8, %c0_9, %c0_10, %c0_11] : memref<1x18x18x8xf32, #tpu.memory_space<vmem>>, vector<1x1x18x8xf32>
    tpu.vector_store %arg8[%c0_8, %c0_9, %c0_10, %c0_11], %7 {strides = array<i32>} : memref<1x18x18x8xf32, #tpu.memory_space<vmem>>, vector<1x1x18x8xf32>,
    %cst_12 = arith.constant 0.000000e+00 : f32
    %9 = vector.broadcast %cst_12 : f32 to vector<1x1x18x8xf32>
    %c0_13 = arith.constant 0 : index
    %c17 = arith.constant 17 : index
    %c0_14 = arith.constant 0 : index
    %c0_15 = arith.constant 0 : index
    %10 = vector.load %arg8[%c0_13, %c17, %c0_14, %c0_15] : memref<1x18x18x8xf32, #tpu.memory_space<vmem>>, vector<1x1x18x8xf32>
    tpu.vector_store %arg8[%c0_13, %c17, %c0_14, %c0_15], %9 {strides = array<i32>} : memref<1x18x18x8xf32, #tpu.memory_space<vmem>>, vector<1x1x18x8xf32>,
    %cst_16 = arith.constant 0.000000e+00 : f32
    %11 = vector.broadcast %cst_16 : f32 to vector<1x18x1x8xf32>
    %c0_17 = arith.constant 0 : index
    %c0_18 = arith.constant 0 : index
    %c0_19 = arith.constant 0 : index
    %c0_20 = arith.constant 0 : index
    %12 = vector.load %arg8[%c0_17, %c0_18, %c0_19, %c0_20] : memref<1x18x18x8xf32, #tpu.memory_space<vmem>>, vector<1x18x1x8xf32>
    tpu.vector_store %arg8[%c0_17, %c0_18, %c0_19, %c0_20], %11 {strides = array<i32>} : memref<1x18x18x8xf32, #tpu.memory_space<vmem>>, vector<1x18x1x8xf32>,
    %cst_21 = arith.constant 0.000000e+00 : f32
    %13 = vector.broadcast %cst_21 : f32 to vector<1x18x1x8xf32>
    %c0_22 = arith.constant 0 : index
    %c0_23 = arith.constant 0 : index
    %c17_24 = arith.constant 17 : index
    %c0_25 = arith.constant 0 : index
    %14 = vector.load %arg8[%c0_22, %c0_23, %c17_24, %c0_25] : memref<1x18x18x8xf32, #tpu.memory_space<vmem>>, vector<1x18x1x8xf32>
    tpu.vector_store %arg8[%c0_22, %c0_23, %c17_24, %c0_25], %13 {strides = array<i32>} : memref<1x18x18x8xf32, #tpu.memory_space<vmem>>, vector<1x18x1x8xf32>,
    %c0_26 = arith.constant 0 : index
    %c0_27 = arith.constant 0 : index
    %c0_28 = arith.constant 0 : index
    %c0_29 = arith.constant 0 : index
    %15 = tpu.strided_load %arg8[%c0_26, %c0_27, %c0_28, %c0_29] {strides = array<i32: 1, 2, 2, 1>} : memref<1x18x18x8xf32, #tpu.memory_space<vmem>>, vector<1x8x8x8xf32>
    %c0_30 = arith.constant 0 : index
    %c0_31 = arith.constant 0 : index
    %c1_32 = arith.constant 1 : index
    %c0_33 = arith.constant 0 : index
    %16 = tpu.strided_load %arg8[%c0_30, %c0_31, %c1_32, %c0_33] {strides = array<i32: 1, 2, 2, 1>} : memref<1x18x18x8xf32, #tpu.memory_space<vmem>>, vector<1x8x8x8xf32>
    %c0_34 = arith.constant 0 : index
    %c0_35 = arith.constant 0 : index
    %c2 = arith.constant 2 : index
    %c0_36 = arith.constant 0 : index
    %17 = tpu.strided_load %arg8[%c0_34, %c0_35, %c2, %c0_36] {strides = array<i32: 1, 2, 2, 1>} : memref<1x18x18x8xf32, #tpu.memory_space<vmem>>, vector<1x8x8x8xf32>
    %c0_37 = arith.constant 0 : index
    %c0_38 = arith.constant 0 : index
    %c3 = arith.constant 3 : index
    %c0_39 = arith.constant 0 : index
    %18 = tpu.strided_load %arg8[%c0_37, %c0_38, %c3, %c0_39] {strides = array<i32: 1, 2, 2, 1>} : memref<1x18x18x8xf32, #tpu.memory_space<vmem>>, vector<1x8x8x8xf32>
    %c0_40 = arith.constant 0 : index
    %c1_41 = arith.constant 1 : index
    %c0_42 = arith.constant 0 : index
    %c0_43 = arith.constant 0 : index
    %19 = tpu.strided_load %arg8[%c0_40, %c1_41, %c0_42, %c0_43] {strides = array<i32: 1, 2, 2, 1>} : memref<1x18x18x8xf32, #tpu.memory_space<vmem>>, vector<1x8x8x8xf32>
    %c0_44 = arith.constant 0 : index
    %c1_45 = arith.constant 1 : index
    %c1_46 = arith.constant 1 : index
    %c0_47 = arith.constant 0 : index
    %20 = tpu.strided_load %arg8[%c0_44, %c1_45, %c1_46, %c0_47] {strides = array<i32: 1, 2, 2, 1>} : memref<1x18x18x8xf32, #tpu.memory_space<vmem>>, vector<1x8x8x8xf32>
    %c0_48 = arith.constant 0 : index
    %c1_49 = arith.constant 1 : index
    %c2_50 = arith.constant 2 : index
    %c0_51 = arith.constant 0 : index
    %21 = tpu.strided_load %arg8[%c0_48, %c1_49, %c2_50, %c0_51] {strides = array<i32: 1, 2, 2, 1>} : memref<1x18x18x8xf32, #tpu.memory_space<vmem>>, vector<1x8x8x8xf32>
    %c0_52 = arith.constant 0 : index
    %c1_53 = arith.constant 1 : index
    %c3_54 = arith.constant 3 : index
    %c0_55 = arith.constant 0 : index
    %22 = tpu.strided_load %arg8[%c0_52, %c1_53, %c3_54, %c0_55] {strides = array<i32: 1, 2, 2, 1>} : memref<1x18x18x8xf32, #tpu.memory_space<vmem>>, vector<1x8x8x8xf32>
    %c0_56 = arith.constant 0 : index
    %c2_57 = arith.constant 2 : index
    %c0_58 = arith.constant 0 : index
    %c0_59 = arith.constant 0 : index
    %23 = tpu.strided_load %arg8[%c0_56, %c2_57, %c0_58, %c0_59] {strides = array<i32: 1, 2, 2, 1>} : memref<1x18x18x8xf32, #tpu.memory_space<vmem>>, vector<1x8x8x8xf32>
    %c0_60 = arith.constant 0 : index
    %c2_61 = arith.constant 2 : index
    %c1_62 = arith.constant 1 : index
    %c0_63 = arith.constant 0 : index
    %24 = tpu.strided_load %arg8[%c0_60, %c2_61, %c1_62, %c0_63] {strides = array<i32: 1, 2, 2, 1>} : memref<1x18x18x8xf32, #tpu.memory_space<vmem>>, vector<1x8x8x8xf32>
    %c0_64 = arith.constant 0 : index
    %c2_65 = arith.constant 2 : index
    %c2_66 = arith.constant 2 : index
    %c0_67 = arith.constant 0 : index
    %25 = tpu.strided_load %arg8[%c0_64, %c2_65, %c2_66, %c0_67] {strides = array<i32: 1, 2, 2, 1>} : memref<1x18x18x8xf32, #tpu.memory_space<vmem>>, vector<1x8x8x8xf32>
    %c0_68 = arith.constant 0 : index
    %c2_69 = arith.constant 2 : index
    %c3_70 = arith.constant 3 : index
    %c0_71 = arith.constant 0 : index
    %26 = tpu.strided_load %arg8[%c0_68, %c2_69, %c3_70, %c0_71] {strides = array<i32: 1, 2, 2, 1>} : memref<1x18x18x8xf32, #tpu.memory_space<vmem>>, vector<1x8x8x8xf32>
    %c0_72 = arith.constant 0 : index
    %c3_73 = arith.constant 3 : index
    %c0_74 = arith.constant 0 : index
    %c0_75 = arith.constant 0 : index
    %27 = tpu.strided_load %arg8[%c0_72, %c3_73, %c0_74, %c0_75] {strides = array<i32: 1, 2, 2, 1>} : memref<1x18x18x8xf32, #tpu.memory_space<vmem>>, vector<1x8x8x8xf32>
    %c0_76 = arith.constant 0 : index
    %c3_77 = arith.constant 3 : index
    %c1_78 = arith.constant 1 : index
    %c0_79 = arith.constant 0 : index
    %28 = tpu.strided_load %arg8[%c0_76, %c3_77, %c1_78, %c0_79] {strides = array<i32: 1, 2, 2, 1>} : memref<1x18x18x8xf32, #tpu.memory_space<vmem>>, vector<1x8x8x8xf32>
    %c0_80 = arith.constant 0 : index
    %c3_81 = arith.constant 3 : index
    %c2_82 = arith.constant 2 : index
    %c0_83 = arith.constant 0 : index
    %29 = tpu.strided_load %arg8[%c0_80, %c3_81, %c2_82, %c0_83] {strides = array<i32: 1, 2, 2, 1>} : memref<1x18x18x8xf32, #tpu.memory_space<vmem>>, vector<1x8x8x8xf32>
    %c0_84 = arith.constant 0 : index
    %c3_85 = arith.constant 3 : index
    %c3_86 = arith.constant 3 : index
    %c0_87 = arith.constant 0 : index
    %30 = tpu.strided_load %arg8[%c0_84, %c3_85, %c3_86, %c0_87] {strides = array<i32: 1, 2, 2, 1>} : memref<1x18x18x8xf32, #tpu.memory_space<vmem>>, vector<1x8x8x8xf32>
    %31 = tpu.concatenate %15, %16, %17, %18, %19, %20, %21, %22, %23, %24, %25, %26, %27, %28, %29, %30 in 3 : vector<1x8x8x8xf32>, vector<1x8x8x8xf32>, vector<1x8x8x8xf32>, vector<1x8x8x8xf32>, vector<1x8x8x8xf32>, vector<1x8x8x8xf32>, vector<1x8x8x8xf32>, vector<1x8x8x8xf32>, vector<1x8x8x8xf32>, vector<1x8x8x8xf32>, vector<1x8x8x8xf32>, vector<1x8x8x8xf32>, vector<1x8x8x8xf32>, vector<1x8x8x8xf32>, vector<1x8x8x8xf32>, vector<1x8x8x8xf32> -> vector<1x8x8x128xf32>
    %32 = vector.shape_cast %31 : vector<1x8x8x128xf32> to vector<64x128xf32>
    %33 = arith.truncf %32 : vector<64x128xf32> to vector<64x128xbf16>
    %c0_88 = arith.constant 0 : index
    %c0_89 = arith.constant 0 : index
    %34 = vector.load %arg2[%c0_88, %c0_89] : memref<128x8xbf16, #tpu.memory_space<vmem>>, vector<128x8xbf16>
    %cst_90 = arith.constant dense<0.000000e+00> : vector<64x8xf32>
    %35 = tpu.matmul %33, %34, %cst_90 {dimension_numbers = #tpu.dot_dimension_numbers<[1], [0], [0], [1], [0, 0, 1, 1], [], []>} : vector<64x128xbf16>, vector<128x8xbf16>, vector<64x8xf32> -> vector<64x8xf32>
    %c0_91 = arith.constant 0 : index
    %c0_92 = arith.constant 0 : index
    %36 = vector.load %arg3[%c0_91, %c0_92] : memref<1x8xf32, #tpu.memory_space<vmem>>, vector<1x8xf32>
    %37 = vector.broadcast %36 : vector<1x8xf32> to vector<64x8xf32>
    %38 = arith.addf %35, %37 : vector<64x8xf32>
    %cst_93 = arith.constant 0.000000e+00 : f32
    %39 = vector.broadcast %cst_93 : f32 to vector<64x8xf32>
    %40 = arith.cmpf ogt, %38, %39 : vector<64x8xf32>
    %cst_94 = arith.constant 2.000000e-01 : f32
    %41 = vector.broadcast %cst_94 : f32 to vector<64x8xf32>
    %42 = arith.mulf %41, %38 : vector<64x8xf32>
    %43 = arith.select %40, %38, %42 : vector<64x8xi1>, vector<64x8xf32>
    %44 = vector.shape_cast %43 : vector<64x8xf32> to vector<1x8x8x8xf32>
    %c0_95 = arith.constant 0 : index
    %c1_96 = arith.constant 1 : index
    %c1_97 = arith.constant 1 : index
    %c0_98 = arith.constant 0 : index
    %45 = vector.load %arg9[%c0_95, %c1_96, %c1_97, %c0_98] : memref<1x10x10x8xf32, #tpu.memory_space<vmem>>, vector<1x8x8x8xf32>
    tpu.vector_store %arg9[%c0_95, %c1_96, %c1_97, %c0_98], %44 {strides = array<i32>} : memref<1x10x10x8xf32, #tpu.memory_space<vmem>>, vector<1x8x8x8xf32>,
    %cst_99 = arith.constant 0.000000e+00 : f32
    %46 = vector.broadcast %cst_99 : f32 to vector<1x1x10x8xf32>
    %c0_100 = arith.constant 0 : index
    %c0_101 = arith.constant 0 : index
    %c0_102 = arith.constant 0 : index
    %c0_103 = arith.constant 0 : index
    %47 = vector.load %arg9[%c0_100, %c0_101, %c0_102, %c0_103] : memref<1x10x10x8xf32, #tpu.memory_space<vmem>>, vector<1x1x10x8xf32>
    tpu.vector_store %arg9[%c0_100, %c0_101, %c0_102, %c0_103], %46 {strides = array<i32>} : memref<1x10x10x8xf32, #tpu.memory_space<vmem>>, vector<1x1x10x8xf32>,
    %cst_104 = arith.constant 0.000000e+00 : f32
    %48 = vector.broadcast %cst_104 : f32 to vector<1x1x10x8xf32>
    %c0_105 = arith.constant 0 : index
    %c9 = arith.constant 9 : index
    %c0_106 = arith.constant 0 : index
    %c0_107 = arith.constant 0 : index
    %49 = vector.load %arg9[%c0_105, %c9, %c0_106, %c0_107] : memref<1x10x10x8xf32, #tpu.memory_space<vmem>>, vector<1x1x10x8xf32>
    tpu.vector_store %arg9[%c0_105, %c9, %c0_106, %c0_107], %48 {strides = array<i32>} : memref<1x10x10x8xf32, #tpu.memory_space<vmem>>, vector<1x1x10x8xf32>,
    %cst_108 = arith.constant 0.000000e+00 : f32
    %50 = vector.broadcast %cst_108 : f32 to vector<1x10x1x8xf32>
    %c0_109 = arith.constant 0 : index
    %c0_110 = arith.constant 0 : index
    %c0_111 = arith.constant 0 : index
    %c0_112 = arith.constant 0 : index
    %51 = vector.load %arg9[%c0_109, %c0_110, %c0_111, %c0_112] : memref<1x10x10x8xf32, #tpu.memory_space<vmem>>, vector<1x10x1x8xf32>
    tpu.vector_store %arg9[%c0_109, %c0_110, %c0_111, %c0_112], %50 {strides = array<i32>} : memref<1x10x10x8xf32, #tpu.memory_space<vmem>>, vector<1x10x1x8xf32>,
    %cst_113 = arith.constant 0.000000e+00 : f32
    %52 = vector.broadcast %cst_113 : f32 to vector<1x10x1x8xf32>
    %c0_114 = arith.constant 0 : index
    %c0_115 = arith.constant 0 : index
    %c9_116 = arith.constant 9 : index
    %c0_117 = arith.constant 0 : index
    %53 = vector.load %arg9[%c0_114, %c0_115, %c9_116, %c0_117] : memref<1x10x10x8xf32, #tpu.memory_space<vmem>>, vector<1x10x1x8xf32>
    tpu.vector_store %arg9[%c0_114, %c0_115, %c9_116, %c0_117], %52 {strides = array<i32>} : memref<1x10x10x8xf32, #tpu.memory_space<vmem>>, vector<1x10x1x8xf32>,
    %c0_118 = arith.constant 0 : index
    %c0_119 = arith.constant 0 : index
    %c0_120 = arith.constant 0 : index
    %c0_121 = arith.constant 0 : index
    %54 = vector.load %arg9[%c0_118, %c0_119, %c0_120, %c0_121] : memref<1x10x10x8xf32, #tpu.memory_space<vmem>>, vector<1x8x8x8xf32>
    %c0_122 = arith.constant 0 : index
    %c0_123 = arith.constant 0 : index
    %c1_124 = arith.constant 1 : index
    %c0_125 = arith.constant 0 : index
    %55 = vector.load %arg9[%c0_122, %c0_123, %c1_124, %c0_125] : memref<1x10x10x8xf32, #tpu.memory_space<vmem>>, vector<1x8x8x8xf32>
    %c0_126 = arith.constant 0 : index
    %c0_127 = arith.constant 0 : index
    %c2_128 = arith.constant 2 : index
    %c0_129 = arith.constant 0 : index
    %56 = vector.load %arg9[%c0_126, %c0_127, %c2_128, %c0_129] : memref<1x10x10x8xf32, #tpu.memory_space<vmem>>, vector<1x8x8x8xf32>
    %c0_130 = arith.constant 0 : index
    %c1_131 = arith.constant 1 : index
    %c0_132 = arith.constant 0 : index
    %c0_133 = arith.constant 0 : index
    %57 = vector.load %arg9[%c0_130, %c1_131, %c0_132, %c0_133] : memref<1x10x10x8xf32, #tpu.memory_space<vmem>>, vector<1x8x8x8xf32>
    %c0_134 = arith.constant 0 : index
    %c1_135 = arith.constant 1 : index
    %c1_136 = arith.constant 1 : index
    %c0_137 = arith.constant 0 : index
    %58 = vector.load %arg9[%c0_134, %c1_135, %c1_136, %c0_137] : memref<1x10x10x8xf32, #tpu.memory_space<vmem>>, vector<1x8x8x8xf32>
    %c0_138 = arith.constant 0 : index
    %c1_139 = arith.constant 1 : index
    %c2_140 = arith.constant 2 : index
    %c0_141 = arith.constant 0 : index
    %59 = vector.load %arg9[%c0_138, %c1_139, %c2_140, %c0_141] : memref<1x10x10x8xf32, #tpu.memory_space<vmem>>, vector<1x8x8x8xf32>
    %c0_142 = arith.constant 0 : index
    %c2_143 = arith.constant 2 : index
    %c0_144 = arith.constant 0 : index
    %c0_145 = arith.constant 0 : index
    %60 = vector.load %arg9[%c0_142, %c2_143, %c0_144, %c0_145] : memref<1x10x10x8xf32, #tpu.memory_space<vmem>>, vector<1x8x8x8xf32>
    %c0_146 = arith.constant 0 : index
    %c2_147 = arith.constant 2 : index
    %c1_148 = arith.constant 1 : index
    %c0_149 = arith.constant 0 : index
    %61 = vector.load %arg9[%c0_146, %c2_147, %c1_148, %c0_149] : memref<1x10x10x8xf32, #tpu.memory_space<vmem>>, vector<1x8x8x8xf32>
    %c0_150 = arith.constant 0 : index
    %c2_151 = arith.constant 2 : index
    %c2_152 = arith.constant 2 : index
    %c0_153 = arith.constant 0 : index
    %62 = vector.load %arg9[%c0_150, %c2_151, %c2_152, %c0_153] : memref<1x10x10x8xf32, #tpu.memory_space<vmem>>, vector<1x8x8x8xf32>
    %63 = tpu.concatenate %54, %55, %56, %57, %58, %59, %60, %61, %62 in 3 : vector<1x8x8x8xf32>, vector<1x8x8x8xf32>, vector<1x8x8x8xf32>, vector<1x8x8x8xf32>, vector<1x8x8x8xf32>, vector<1x8x8x8xf32>, vector<1x8x8x8xf32>, vector<1x8x8x8xf32>, vector<1x8x8x8xf32> -> vector<1x8x8x72xf32>
    %64 = vector.shape_cast %63 : vector<1x8x8x72xf32> to vector<64x72xf32>
    %65 = arith.truncf %64 : vector<64x72xf32> to vector<64x72xbf16>
    %c0_154 = arith.constant 0 : index
    %c0_155 = arith.constant 0 : index
    %66 = vector.load %arg4[%c0_154, %c0_155] : memref<72x16xbf16, #tpu.memory_space<vmem>>, vector<72x16xbf16>
    %cst_156 = arith.constant dense<0.000000e+00> : vector<64x16xf32>
    %67 = tpu.matmul %65, %66, %cst_156 {dimension_numbers = #tpu.dot_dimension_numbers<[1], [0], [0], [1], [0, 0, 1, 1], [], []>} : vector<64x72xbf16>, vector<72x16xbf16>, vector<64x16xf32> -> vector<64x16xf32>
    %c0_157 = arith.constant 0 : index
    %c0_158 = arith.constant 0 : index
    %68 = vector.load %arg5[%c0_157, %c0_158] : memref<1x16xf32, #tpu.memory_space<vmem>>, vector<1x16xf32>
    %69 = vector.broadcast %68 : vector<1x16xf32> to vector<64x16xf32>
    %70 = arith.addf %67, %69 : vector<64x16xf32>
    %c0_159 = arith.constant 0 : index
    %c0_160 = arith.constant 0 : index
    %c0_161 = arith.constant 0 : index
    %c0_162 = arith.constant 0 : index
    %71 = tpu.strided_load %arg1[%c0_159, %c0_160, %c0_161, %c0_162] {strides = array<i32: 1, 2, 2, 1>} : memref<1x16x16x8xf32, #tpu.memory_space<vmem>>, vector<1x8x8x8xf32>
    %c0_163 = arith.constant 0 : index
    %c0_164 = arith.constant 0 : index
    %c1_165 = arith.constant 1 : index
    %c0_166 = arith.constant 0 : index
    %72 = tpu.strided_load %arg1[%c0_163, %c0_164, %c1_165, %c0_166] {strides = array<i32: 1, 2, 2, 1>} : memref<1x16x16x8xf32, #tpu.memory_space<vmem>>, vector<1x8x8x8xf32>
    %73 = arith.addf %71, %72 : vector<1x8x8x8xf32>
    %c0_167 = arith.constant 0 : index
    %c1_168 = arith.constant 1 : index
    %c0_169 = arith.constant 0 : index
    %c0_170 = arith.constant 0 : index
    %74 = tpu.strided_load %arg1[%c0_167, %c1_168, %c0_169, %c0_170] {strides = array<i32: 1, 2, 2, 1>} : memref<1x16x16x8xf32, #tpu.memory_space<vmem>>, vector<1x8x8x8xf32>
    %75 = arith.addf %73, %74 : vector<1x8x8x8xf32>
    %c0_171 = arith.constant 0 : index
    %c1_172 = arith.constant 1 : index
    %c1_173 = arith.constant 1 : index
    %c0_174 = arith.constant 0 : index
    %76 = tpu.strided_load %arg1[%c0_171, %c1_172, %c1_173, %c0_174] {strides = array<i32: 1, 2, 2, 1>} : memref<1x16x16x8xf32, #tpu.memory_space<vmem>>, vector<1x8x8x8xf32>
    %77 = arith.addf %75, %76 : vector<1x8x8x8xf32>
    %cst_175 = arith.constant 2.500000e-01 : f32
    %78 = vector.broadcast %cst_175 : f32 to vector<1x8x8x8xf32>
    %79 = arith.mulf %77, %78 : vector<1x8x8x8xf32>
    %80 = vector.shape_cast %79 : vector<1x8x8x8xf32> to vector<64x8xf32>
    %81 = arith.truncf %80 : vector<64x8xf32> to vector<64x8xbf16>
    %c0_176 = arith.constant 0 : index
    %c0_177 = arith.constant 0 : index
    %82 = vector.load %arg6[%c0_176, %c0_177] : memref<8x16xbf16, #tpu.memory_space<vmem>>, vector<8x16xbf16>
    %cst_178 = arith.constant dense<0.000000e+00> : vector<64x16xf32>
    %83 = tpu.matmul %81, %82, %cst_178 {dimension_numbers = #tpu.dot_dimension_numbers<[1], [0], [0], [1], [0, 0, 1, 1], [], []>} : vector<64x8xbf16>, vector<8x16xbf16>, vector<64x16xf32> -> vector<64x16xf32>
    %84 = arith.addf %70, %83 : vector<64x16xf32>
    %cst_179 = arith.constant 0.707106769 : f32
    %85 = vector.broadcast %cst_179 : f32 to vector<64x16xf32>
    %86 = arith.mulf %84, %85 : vector<64x16xf32>
    %87 = vector.shape_cast %86 : vector<64x16xf32> to vector<1x64x16xf32>
    %c0_180 = arith.constant 0 : index
    %c0_181 = arith.constant 0 : index
    %c0_182 = arith.constant 0 : index
    %88 = vector.load %arg7[%c0_180, %c0_181, %c0_182] : memref<1x64x16xf32, #tpu.memory_space<vmem>>, vector<1x64x16xf32>
    tpu.vector_store %arg7[%c0_180, %c0_181, %c0_182], %87 {strides = array<i32>} : memref<1x64x16xf32, #tpu.memory_space<vmem>>, vector<1x64x16xf32>,
    return
  }
  func.func @transform_0(%arg0: i32) -> (i32, i32, i32, i32) {
    %c0_i32 = arith.constant 0 : i32
    %c0_i32_0 = arith.constant 0 : i32
    %c0_i32_1 = arith.constant 0 : i32
    %c0_i32_2 = arith.constant 0 : i32
    return %arg0, %c0_i32, %c0_i32_0, %c0_i32_1 : i32, i32, i32, i32
  }
  func.func @transform_1(%arg0: i32) -> (i32, i32) {
    %c0_i32 = arith.constant 0 : i32
    %c0_i32_0 = arith.constant 0 : i32
    %c0_i32_1 = arith.constant 0 : i32
    return %c0_i32, %c0_i32_0 : i32, i32
  }
  func.func @transform_2(%arg0: i32) -> (i32, i32) {
    %c0_i32 = arith.constant 0 : i32
    %c0_i32_0 = arith.constant 0 : i32
    %c0_i32_1 = arith.constant 0 : i32
    return %c0_i32, %c0_i32_0 : i32, i32
  }
  func.func @transform_3(%arg0: i32) -> (i32, i32) {
    %c0_i32 = arith.constant 0 : i32
    %c0_i32_0 = arith.constant 0 : i32
    %c0_i32_1 = arith.constant 0 : i32
    return %c0_i32, %c0_i32_0 : i32, i32
  }
  func.func @transform_4(%arg0: i32) -> (i32, i32) {
    %c0_i32 = arith.constant 0 : i32
    %c0_i32_0 = arith.constant 0 : i32
    %c0_i32_1 = arith.constant 0 : i32
    return %c0_i32, %c0_i32_0 : i32, i32
  }
  func.func @transform_5(%arg0: i32) -> (i32, i32) {
    %c0_i32 = arith.constant 0 : i32
    %c0_i32_0 = arith.constant 0 : i32
    %c0_i32_1 = arith.constant 0 : i32
    return %c0_i32, %c0_i32_0 : i32, i32
  }
  func.func @transform_6(%arg0: i32) -> (i32, i32, i32) {
    %c0_i32 = arith.constant 0 : i32
    %c0_i32_0 = arith.constant 0 : i32
    %c0_i32_1 = arith.constant 0 : i32
    return %arg0, %c0_i32, %c0_i32_0 : i32, i32, i32
  }
}

</mosaic_0001>

<bundles_post_ra>
// kernel: tpu_custom_call.1
= control target key start
LH: loop header
LB: loop body
LE: loop exit
PB: predicated region body
PF: predicated region fallthrough
CT: control target
= control target key end

     0   :  { %s3117_s21 = smov 0   ;;  %s4008_s0 = inlined_call_operand.vmem [shape: f32[2,16,16,8], index: 0, kind: input, shape index: {}]   ;;  %s4009_s1 = inlined_call_operand.vmem [shape: bf16[128,8], index: 1, kind: input, shape index: {}]   ;;  %s4010_s2 = inlined_call_operand.vmem [shape: f32[1,8], index: 2, kind: input, shape index: {}]   ;;  %s4011_s3 = inlined_call_operand.vmem [shape: bf16[72,16], index: 3, kind: input, shape index: {}]   ;;  %s4012_s4 = inlined_call_operand.vmem [shape: f32[1,16], index: 4, kind: input, shape index: {}]   ;;  %s4013_s5 = inlined_call_operand.vmem [shape: bf16[8,16], index: 5, kind: input, shape index: {}]   ;;  %s4014_s6 = inlined_call_operand.vmem [shape: f32[2,64,16], index: 6, kind: output, shape index: {}]  }
   0x1 LB: > { %s2414_s22 = sadd.s32 4294967295, %s3064_s21   ;;  %p2418_p0 = scmp.ge.s32.totalorder %s3064_s21, 1  ;;  %s3064_s21 = sphi %s3117_s21, %s16_s21  }
   0x2   : > { %p212_p1 = scmp.lt.s32.totalorder %s3064_s21, 3 }
   0x4   : > { %p213_p2 = pnand %p2418_p0, %p212_p1 }
   0x5   : > { %p3127_p3 = scmp.lt.s32.totalorder (!%p213_p2), %s2414_s22, 1  ;;  %s3067_s28 = smov (!%p213_p2), 16  }
   0x6   : > { %216 = sbr.rel (%p213_p2) target bundleno = 882 (0x372), region = 44  ;;  %s3068_s29 = smov (!%p213_p2), 8  }
   0x7   : > { %s3069_s30 = smov (!%p213_p2), 24   ;;  %s3070_s7 = smov (!%p213_p2), 32  }
   0x8   : > { %s3071_s8 = smov (!%p213_p2), 40   ;;  %s3072_s9 = smov (!%p213_p2), 48  }
   0x9   : > { %s3073_s10 = smov (!%p213_p2), 56   ;;  %s3074_s11 = smov (!%p213_p2), 64  }
   0xa   : > { %s3075_s12 = smov (!%p213_p2), 72   ;;  %s3076_s13 = smov (!%p213_p2), 80  }
   0xb   : > { %vm382_vm0 = vcmask 64512   ;;  %vm417_vm1 = vcmask 58368   ;;  %vm423_vm2 = vcmask 57344   ;;  %v3066_v0 = vmov 0.0   ;;  %s4017_s22 = smov (!%p3127_p3, %s2414_s22), 1  ;;  %s3077_s14 = smov 88  }
   0xc   : > { %415 = vst.msk [vmem:[#allocation2] sm:$0xff] %vm382_vm0, %v3066_v0  ;;  %416 = vst.msk [vmem:[#allocation2 + $0x8] sm:$0xff] %vm382_vm0, %v3066_v0  ;;  %s2479_s24 = sshll.u32 %s4017_s22, 8  ;;  %s3078_s23 = smov 96  }
   0xd   : > { %418 = vst.msk [vmem:[#allocation2 + $0x10] sm:$0x3] %vm417_vm1, %v3066_v0  ;;  %422 = vst.msk [vmem:[#allocation2 + $0x1a8] sm:$0x3] %vm417_vm1, %v3066_v0  ;;  %s3273_s27 = scalar_lea.vmem %s4008_s0, %s2479_s24  ;;  %s3079_s16 = smov 104  }
   0xe   : > { %420 = vst.msk [vmem:[#allocation2 + $0x198] sm:$0xff] %vm382_vm0, %v3066_v0  ;;  %421 = vst.msk [vmem:[#allocation2 + $0x1a0] sm:$0xff] %vm382_vm0, %v3066_v0  ;;  %v255_v1 = vld [vmem:[%s3273_s27 + $0x10] sm:$0xff]  ;;  %v256_v2 = vld [vmem:[%s3273_s27 + $0x18] sm:$0xff]  ;;  %s3080_s24 = smov 112   ;;  %s3081_s15 = smov 120  }
   0xf   : > { %425 = vst.msk [vmem:[#allocation2 + $0x18] sm:$0x1] %vm423_vm2, %v3066_v0  ;;  %426 = vst.msk [vmem:[#allocation2 + $0x30] sm:$0x1] %vm423_vm2, %v3066_v0  ;;  %v259_v3 = vld [vmem:[%s3273_s27 + $0x30] sm:$0xff]  ;;  %vm287_vm3 = vcmp.gt.f32.partialorder %v255_v1, 0.0 }
  0x10   : > { %427 = vst.msk [vmem:[#allocation2 + $0x48] sm:$0x1] %vm423_vm2, %v3066_v0  ;;  %428 = vst.msk [vmem:[#allocation2 + $0x60] sm:$0x1] %vm423_vm2, %v3066_v0  ;;  %vm288_vm4 = vcmp.gt.f32.partialorder %v256_v2, 0.0  ;;  %v260_v6 = vld [vmem:[%s3273_s27 + $0x38] sm:$0xff] }
  0x11   : > { %429 = vst.msk [vmem:[#allocation2 + $0x78] sm:$0x1] %vm423_vm2, %v3066_v0  ;;  %430 = vst.msk [vmem:[#allocation2 + $0x90] sm:$0x1] %vm423_vm2, %v3066_v0  ;;  %v319_v4 = vmul.f32 0.2, %v255_v1 }
  0x12   : > { %431 = vst.msk [vmem:[#allocation2 + $0xa8] sm:$0x1] %vm423_vm2, %v3066_v0  ;;  %432 = vst.msk [vmem:[#allocation2 + $0xc0] sm:$0x1] %vm423_vm2, %v3066_v0  ;;  %v320_v5 = vmul.f32 0.2, %v256_v2 }
  0x13   : > { %433 = vst.msk [vmem:[#allocation2 + $0xd8] sm:$0x1] %vm423_vm2, %v3066_v0  ;;  %434 = vst.msk [vmem:[#allocation2 + $0xf0] sm:$0x1] %vm423_vm2, %v3066_v0  ;;  %vm291_vm5 = vcmp.gt.f32.partialorder %v259_v3, 0.0  ;;  %v351_v7 = vsel %vm287_vm3, %v255_v1, %v319_v4  ;;  %v263_v9 = vld [vmem:[%s3273_s27 + $0x50] sm:$0xff] }
  0x14   : > { %435 = vst.msk [vmem:[#allocation2 + $0x108] sm:$0x1] %vm423_vm2, %v3066_v0  ;;  %436 = vst.msk [vmem:[#allocation2 + $0x120] sm:$0x1] %vm423_vm2, %v3066_v0  ;;  %v352_v8 = vsel %vm288_vm4, %v256_v2, %v320_v5  ;;  %v264_v10 = vld [vmem:[%s3273_s27 + $0x58] sm:$0xff]  ;;  %vm292_vm6 = vcmp.gt.f32.partialorder %v260_v6, 0.0 }
  0x15   : > { %437 = vst.msk [vmem:[#allocation2 + $0x138] sm:$0x1] %vm423_vm2, %v3066_v0  ;;  %438 = vst.msk [vmem:[#allocation2 + $0x150] sm:$0x1] %vm423_vm2, %v3066_v0  ;;  %v323_v11 = vmul.f32 0.2, %v259_v3 }
  0x16   : > { %439 = vst.msk [vmem:[#allocation2 + $0x168] sm:$0x1] %vm423_vm2, %v3066_v0  ;;  %440 = vst.msk [vmem:[#allocation2 + $0x180] sm:$0x1] %vm423_vm2, %v3066_v0  ;;  %v261_v12 = vld [vmem:[%s3273_s27 + $0x40] sm:$0xff]  ;;  %vm295_vm7 = vcmp.gt.f32.partialorder %v263_v9, 0.0 }
  0x17   : > { %443 = vst.msk [vmem:[#allocation2 + $0x29] sm:$0x1] %vm423_vm2, %v3066_v0  ;;  %444 = vst.msk [vmem:[#allocation2 + $0x41] sm:$0x1] %vm423_vm2, %v3066_v0  ;;  %vm296_vm8 = vcmp.gt.f32.partialorder %v264_v10, 0.0  ;;  %v355_v16 = vsel %vm291_vm5, %v259_v3, %v323_v11  ;;  %v262_v17 = vld [vmem:[%s3273_s27 + $0x48] sm:$0xff] }
  0x18   : > { %445 = vst.msk [vmem:[#allocation2 + $0x59] sm:$0x1] %vm423_vm2, %v3066_v0  ;;  %446 = vst.msk [vmem:[#allocation2 + $0x71] sm:$0x1] %vm423_vm2, %v3066_v0  ;;  %v324_v13 = vmul.f32 0.2, %v260_v6 }
  0x19   : > { %447 = vst.msk [vmem:[#allocation2 + $0x89] sm:$0x1] %vm423_vm2, %v3066_v0  ;;  %448 = vst.msk [vmem:[#allocation2 + $0xa1] sm:$0x1] %vm423_vm2, %v3066_v0  ;;  %v327_v14 = vmul.f32 0.2, %v263_v9 }
  0x1a   : > { %449 = vst.msk [vmem:[#allocation2 + $0xb9] sm:$0x1] %vm423_vm2, %v3066_v0  ;;  %450 = vst.msk [vmem:[#allocation2 + $0xd1] sm:$0x1] %vm423_vm2, %v3066_v0  ;;  %v328_v15 = vmul.f32 0.2, %v264_v10  ;;  %v356_v19 = vsel %vm292_vm6, %v260_v6, %v324_v13 }
  0x1b   : > { %451 = vst.msk [vmem:[#allocation2 + $0xe9] sm:$0x1] %vm423_vm2, %v3066_v0  ;;  %452 = vst.msk [vmem:[#allocation2 + $0x101] sm:$0x1] %vm423_vm2, %v3066_v0  ;;  %v265_v18 = vld [vmem:[%s3273_s27 + $0x60] sm:$0xff]  ;;  %v359_v20 = vsel %vm295_vm7, %v263_v9, %v327_v14  ;;  %v266_v21 = vld [vmem:[%s3273_s27 + $0x68] sm:$0xff] }
  0x1c   : > { %453 = vst.msk [vmem:[#allocation2 + $0x119] sm:$0x1] %vm423_vm2, %v3066_v0  ;;  %454 = vst.msk [vmem:[#allocation2 + $0x131] sm:$0x1] %vm423_vm2, %v3066_v0  ;;  %vm293_vm9 = vcmp.gt.f32.partialorder %v261_v12, 0.0  ;;  %vm294_vm10 = vcmp.gt.f32.partialorder %v262_v17, 0.0  ;;  %v360_v23 = vsel %vm296_vm8, %v264_v10, %v328_v15 }
  0x1d   : > { %455 = vst.msk [vmem:[#allocation2 + $0x149] sm:$0x1] %vm423_vm2, %v3066_v0  ;;  %456 = vst.msk [vmem:[#allocation2 + $0x161] sm:$0x1] %vm423_vm2, %v3066_v0  ;;  %v253_v22 = vld [vmem:[%s3273_s27] sm:$0xff]  ;;  %vm297_vm11 = vcmp.gt.f32.partialorder %v265_v18, 0.0 }
  0x1e   : > { %457 = vst.msk [vmem:[#allocation2 + $0x179] sm:$0x1] %vm423_vm2, %v3066_v0  ;;  %458 = vst.msk [vmem:[#allocation2 + $0x191] sm:$0x1] %vm423_vm2, %v3066_v0  ;;  %vm298_vm12 = vcmp.gt.f32.partialorder %v266_v21, 0.0  ;;  %v254_v25 = vld [vmem:[%s3273_s27 + $0x8] sm:$0xff] }
  0x1f   : > { %1501 = vst.msk [vmem:[#allocation3] sm:$0xff] %vm382_vm0, %v3066_v0  ;;  %1504 = vst.msk [vmem:[#allocation3 + $0x90] sm:$0xff] %vm382_vm0, %v3066_v0  ;;  %v325_v24 = vmul.f32 0.2, %v261_v12  ;;  %v257_v26 = vld [vmem:[%s3273_s27 + $0x20] sm:$0xff]  ;;  %v258_v33 = vld [vmem:[%s3273_s27 + $0x28] sm:$0xff] }
  0x20   : > { %1502 = vst.msk [vmem:[#allocation3 + $0x8] sm:$0x3] %vm417_vm1, %v3066_v0  ;;  %1505 = vst.msk [vmem:[#allocation3 + $0x98] sm:$0x3] %vm417_vm1, %v3066_v0  ;;  %v326_v27 = vmul.f32 0.2, %v262_v17 }
  0x21   : > { %1507 = vst.msk [vmem:[#allocation3 + $0x10] sm:$0x1] %vm423_vm2, %v3066_v0  ;;  %1508 = vst.msk [vmem:[#allocation3 + $0x20] sm:$0x1] %vm423_vm2, %v3066_v0  ;;  %v329_v28 = vmul.f32 0.2, %v265_v18  ;;  %v357_v32 = vsel %vm293_vm9, %v261_v12, %v325_v24 }
  0x22   : > { %1509 = vst.msk [vmem:[#allocation3 + $0x30] sm:$0x1] %vm423_vm2, %v3066_v0  ;;  %1510 = vst.msk [vmem:[#allocation3 + $0x40] sm:$0x1] %vm423_vm2, %v3066_v0  ;;  %v330_v29 = vmul.f32 0.2, %v266_v21  ;;  %v358_v34 = vsel %vm294_vm10, %v262_v17, %v326_v27 }
  0x23   : > { %1511 = vst.msk [vmem:[#allocation3 + $0x50] sm:$0x1] %vm423_vm2, %v3066_v0  ;;  %1512 = vst.msk [vmem:[#allocation3 + $0x60] sm:$0x1] %vm423_vm2, %v3066_v0  ;;  %v492_v30 = vld [vmem:[#allocation2 + $0x2] ss:$2 sm:$0xff]  ;;  %v361_v35 = vsel %vm297_vm11, %v265_v18, %v329_v28 }
  0x24   : > { %1513 = vst.msk [vmem:[#allocation3 + $0x70] sm:$0x1] %vm423_vm2, %v3066_v0  ;;  %1514 = vst.msk [vmem:[#allocation3 + $0x80] sm:$0x1] %vm423_vm2, %v3066_v0  ;;  %v476_v31 = vld [vmem:[#allocation2 + $0x1] ss:$2 sm:$0xff]  ;;  %v362_v36 = vsel %vm298_vm12, %v266_v21, %v330_v29 }
  0x25   : > { %1517 = vst.msk [vmem:[#allocation3 + $0x19] sm:$0x1] %vm423_vm2, %v3066_v0  ;;  %1518 = vst.msk [vmem:[#allocation3 + $0x29] sm:$0x1] %vm423_vm2, %v3066_v0  ;;  %vm285_vm13 = vcmp.gt.f32.partialorder %v253_v22, 0.0  ;;  %vm286_vm14 = vcmp.gt.f32.partialorder %v254_v25, 0.0 }
  0x26   : > { %1519 = vst.msk [vmem:[#allocation3 + $0x39] sm:$0x1] %vm423_vm2, %v3066_v0  ;;  %1520 = vst.msk [vmem:[#allocation3 + $0x49] sm:$0x1] %vm423_vm2, %v3066_v0  ;;  %vm289_vm15 = vcmp.gt.f32.partialorder %v257_v26, 0.0  ;;  %vm290_vm1 = vcmp.gt.f32.partialorder %v258_v33, 0.0 }
  0x27   : > { %1521 = vst.msk [vmem:[#allocation3 + $0x59] sm:$0x1] %vm423_vm2, %v3066_v0  ;;  %1522 = vst.msk [vmem:[#allocation3 + $0x69] sm:$0x1] %vm423_vm2, %v3066_v0  ;;  %v317_v41 = vmul.f32 0.2, %v253_v22 }
  0x28   : > { %1523 = vst.msk [vmem:[#allocation3 + $0x79] sm:$0x1] %vm423_vm2, %v3066_v0  ;;  %1524 = vst.msk [vmem:[#allocation3 + $0x89] sm:$0x1] %vm423_vm2, %v3066_v0  ;;  %v267_v42 = vld [vmem:[%s3273_s27 + $0x70] sm:$0xff]  ;;  %v268_v60 = vld [vmem:[%s3273_s27 + $0x78] sm:$0xff] }
  0x29   : > { %442 = vst.msk [vmem:[#allocation2 + $0x11] sm:$0x1] %vm423_vm2, %v3066_v0  ;;  %424 = vst.msk [vmem:[#allocation2] sm:$0x1] %vm423_vm2, %v3066_v0  ;;  %v318_v45 = vmul.f32 0.2, %v254_v25  ;;  %v349_v51 = vsel %vm285_vm13, %v253_v22, %v317_v41 }
  0x2a   : > { %441 = vst.msk [vmem:[#allocation2 + $0x198] sm:$0x1] %vm423_vm2, %v3066_v0  ;;  %459 = vst.msk [vmem:[#allocation2 + $0x1a9] sm:$0x1] %vm423_vm2, %v3066_v0  ;;  %v321_v46 = vmul.f32 0.2, %v257_v26 }
  0x2b   : > { %1506 = vst.msk [vmem:[#allocation3] sm:$0x1] %vm423_vm2, %v3066_v0  ;;  %1515 = vst.msk [vmem:[#allocation3 + $0x90] sm:$0x1] %vm423_vm2, %v3066_v0  ;;  %v322_v47 = vmul.f32 0.2, %v258_v33  ;;  %v350_v55 = vsel %vm286_vm14, %v254_v25, %v318_v45 }
  0x2c   : > { %1516 = vst.msk [vmem:[#allocation3 + $0x9] sm:$0x1] %vm423_vm2, %v3066_v0  ;;  %1525 = vst.msk [vmem:[#allocation3 + $0x99] sm:$0x1] %vm423_vm2, %v3066_v0  ;;  %v353_v56 = vsel %vm289_vm15, %v257_v26, %v321_v46  ;;  %vm299_vm2 = vcmp.gt.f32.partialorder %v267_v42, 0.0  ;;  %v271_v61 = vld [vmem:[%s3273_s27 + $0x90] sm:$0xff] }
  0x2d   : > { %385 = vst.msk [vmem:[#allocation2 + $0x31] sm:$0xff] %vm382_vm0, %v351_v7  ;;  %386 = vst.msk [vmem:[#allocation2 + $0x39] sm:$0xff] %vm382_vm0, %v352_v8  ;;  %v354_v57 = vsel %vm290_vm1, %v258_v33, %v322_v47  ;;  %v272_v62 = vld [vmem:[%s3273_s27 + $0x98] sm:$0xff]  ;;  %v331_v63 = vmul.f32 0.2, %v267_v42  ;;  %vm300_vm3 = vcmp.gt.f32.partialorder %v268_v60, 0.0 }
  0x2e   : > { %389 = vst.msk [vmem:[#allocation2 + $0x61] sm:$0xff] %vm382_vm0, %v355_v16  ;;  %390 = vst.msk [vmem:[#allocation2 + $0x69] sm:$0xff] %vm382_vm0, %v356_v19  ;;  %vm303_vm4 = vcmp.gt.f32.partialorder %v271_v61, 0.0  ;;  %vm304_vm5 = vcmp.gt.f32.partialorder %v272_v62, 0.0  ;;  %v332_v6 = vmul.f32 0.2, %v268_v60 }
  0x2f   : > { %393 = vst.msk [vmem:[#allocation2 + $0x91] sm:$0xff] %vm382_vm0, %v359_v20  ;;  %394 = vst.msk [vmem:[#allocation2 + $0x99] sm:$0xff] %vm382_vm0, %v360_v23  ;;  %v363_v4 = vsel %vm299_vm2, %v267_v42, %v331_v63  ;;  %v275_v7 = vld [vmem:[%s3273_s27 + $0xb0] sm:$0xff]  ;;  %v276_v8 = vld [vmem:[%s3273_s27 + $0xb8] sm:$0xff]  ;;  %v335_v10 = vmul.f32 0.2, %v271_v61 }
  0x30   : > { %391 = vst.msk [vmem:[#allocation2 + $0x79] sm:$0xff] %vm382_vm0, %v357_v32  ;;  %392 = vst.msk [vmem:[#allocation2 + $0x81] sm:$0xff] %vm382_vm0, %v358_v34  ;;  %v508_v43 = vld [vmem:[#allocation2 + $0x3] ss:$2 sm:$0xff]  ;;  %v336_v11 = vmul.f32 0.2, %v272_v62  ;;  %v364_v13 = vsel %vm300_vm3, %v268_v60, %v332_v6 }
  0x31   : > { %395 = vst.msk [vmem:[#allocation2 + $0xa9] sm:$0xff] %vm382_vm0, %v361_v35  ;;  %396 = vst.msk [vmem:[#allocation2 + $0xb1] sm:$0xff] %vm382_vm0, %v362_v36  ;;  %v279_v14 = vld [vmem:[%s3273_s27 + $0xd0] sm:$0xff]  ;;  %v280_v15 = vld [vmem:[%s3273_s27 + $0xd8] sm:$0xff]  ;;  %v367_v19 = vsel %vm303_vm4, %v271_v61, %v335_v10  ;;  %vm307_vm6 = vcmp.gt.f32.partialorder %v275_v7, 0.0  ;;  %vm308_vm7 = vcmp.gt.f32.partialorder %v276_v8, 0.0 }
  0x32   : > { %383 = vst.msk [vmem:[#allocation2 + $0x19] sm:$0xff] %vm382_vm0, %v349_v51  ;;  %384 = vst.msk [vmem:[#allocation2 + $0x21] sm:$0xff] %vm382_vm0, %v350_v55  ;;  %v368_v20 = vsel %vm304_vm5, %v272_v62, %v336_v11  ;;  %vm311_vm8 = vcmp.gt.f32.partialorder %v279_v14, 0.0  ;;  %vm312_vm9 = vcmp.gt.f32.partialorder %v280_v15, 0.0  ;;  %v339_v27 = vmul.f32 0.2, %v275_v7 }
  0x33   : > { %387 = vst.msk [vmem:[#allocation2 + $0x49] sm:$0xff] %vm382_vm0, %v353_v56  ;;  %388 = vst.msk [vmem:[#allocation2 + $0x51] sm:$0xff] %vm382_vm0, %v354_v57  ;;  %v340_v28 = vmul.f32 0.2, %v276_v8  ;;  %v343_v29 = vmul.f32 0.2, %v279_v14 }
  0x34   : > { %v494_v37 = vld [vmem:[#allocation2 + $0x32] ss:$2 sm:$0xff]  ;;  %v478_v38 = vld [vmem:[#allocation2 + $0x31] ss:$2 sm:$0xff]  ;;  %397 = vst.msk [vmem:[#allocation2 + $0xc1] sm:$0xff] %vm382_vm0, %v363_v4  ;;  %398 = vst.msk [vmem:[#allocation2 + $0xc9] sm:$0xff] %vm382_vm0, %v364_v13  ;;  %v371_v34 = vsel %vm307_vm6, %v275_v7, %v339_v27 }
  0x35   : > { %v2595_v39 = vpack.i.bf16 %v494_v37, %v492_v30  ;;  %v2585_v40 = vpack.i.bf16 %v478_v38, %v476_v31  ;;  %v510_v44 = vld [vmem:[#allocation2 + $0x33] ss:$2 sm:$0xff]  ;;  %v496_v48 = vld [vmem:[#allocation2 + $0x62] ss:$2 sm:$0xff]  ;;  %v512_v50 = vld [vmem:[#allocation2 + $0x63] ss:$2 sm:$0xff]  ;;  %v372_v35 = vsel %vm308_vm7, %v276_v8, %v340_v28  ;;  %v375_v36 = vsel %vm311_vm8, %v279_v14, %v343_v29 }
  0x36   : > { %v480_v49 = vld [vmem:[#allocation2 + $0x61] ss:$2 sm:$0xff]  ;;  %v498_v52 = vld [vmem:[#allocation2 + $0x92] ss:$2 sm:$0xff]  ;;  %v482_v53 = vld [vmem:[#allocation2 + $0x91] ss:$2 sm:$0xff]  ;;  %v2605_v1 = vpack.i.bf16 %v510_v44, %v508_v43 }
  0x37   : > { %2596 = vrot.lane.b32.xlu1 %v2595_v39, %s3067_s28  ;;  %2586 = vrot.lane.b32.xlu0 %v2585_v40, %s3068_s29  ;;  %v514_v54 = vld [vmem:[#allocation2 + $0x93] ss:$2 sm:$0xff]  ;;  %v2600_v58 = vpack.i.bf16 %v498_v52, %v496_v48  ;;  %v2590_v59 = vpack.i.bf16 %v482_v53, %v480_v49  ;;  %v527_v2 = vld [vmem:[#allocation2 + $0x78] ss:$2 sm:$0xff]  ;;  %401 = vst.msk [vmem:[#allocation2 + $0xf1] sm:$0xff] %vm382_vm0, %v367_v19  ;;  %402 = vst.msk [vmem:[#allocation2 + $0xf9] sm:$0xff] %vm382_vm0, %v368_v20 }
  0x38   : > { %v2610_v0 = vpack.i.bf16 %v514_v54, %v512_v50  ;;  %v529_v3 = vld [vmem:[#allocation2 + $0xa8] ss:$2 sm:$0xff]  ;;  %v543_v5 = vld [vmem:[#allocation2 + $0x79] ss:$2 sm:$0xff]  ;;  %v545_v9 = vld [vmem:[#allocation2 + $0xa9] ss:$2 sm:$0xff] }
  0x39   : > { %v2620_v12 = vpack.i.bf16 %v529_v3, %v527_v2  ;;  %v523_v16 = vld [vmem:[#allocation2 + $0x18] ss:$2 sm:$0xff]  ;;  %v539_v18 = vld [vmem:[#allocation2 + $0x19] ss:$2 sm:$0xff]  ;;  %v2630_v22 = vpack.i.bf16 %v545_v9, %v543_v5  ;;  %v344_v32 = vmul.f32 0.2, %v280_v15 }
  0x3a   : > { %v525_v17 = vld [vmem:[#allocation2 + $0x48] ss:$2 sm:$0xff]  ;;  %v541_v23 = vld [vmem:[#allocation2 + $0x49] ss:$2 sm:$0xff]  ;;  %405 = vst.msk [vmem:[#allocation2 + $0x121] sm:$0xff] %vm382_vm0, %v371_v34  ;;  %406 = vst.msk [vmem:[#allocation2 + $0x129] sm:$0xff] %vm382_vm0, %v372_v35 }
  0x3b   : > { %2601 = vrot.lane.b32.xlu1 %v2600_v58, %s3067_s28  ;;  %2591 = vrot.lane.b32.xlu0 %v2590_v59, %s3068_s29  ;;  %v2615_v21 = vpack.i.bf16 %v525_v17, %v523_v16  ;;  %v559_v24 = vld [vmem:[#allocation2 + $0x7a] ss:$2 sm:$0xff]  ;;  %v561_v25 = vld [vmem:[#allocation2 + $0xaa] ss:$2 sm:$0xff]  ;;  %v2625_v26 = vpack.i.bf16 %v541_v23, %v539_v18  ;;  %v575_v33 = vld [vmem:[#allocation2 + $0x7b] ss:$2 sm:$0xff]  ;;  %v376_v38 = vsel %vm312_vm9, %v280_v15, %v344_v32 }
  0x3c   : > { %v555_v30 = vld [vmem:[#allocation2 + $0x1a] ss:$2 sm:$0xff]  ;;  %v557_v31 = vld [vmem:[#allocation2 + $0x4a] ss:$2 sm:$0xff]  ;;  %v577_v37 = vld [vmem:[#allocation2 + $0xab] ss:$2 sm:$0xff]  ;;  %v2640_v41 = vpack.i.bf16 %v561_v25, %v559_v24 }
  0x3d   : > { %409 = vst.msk [vmem:[#allocation2 + $0x151] sm:$0xff] %vm382_vm0, %v375_v36  ;;  %v269_v39 = vld [vmem:[%s3273_s27 + $0x80] sm:$0xff]  ;;  %v270_v40 = vld [vmem:[%s3273_s27 + $0x88] sm:$0xff]  ;;  %v2635_v42 = vpack.i.bf16 %v557_v31, %v555_v30  ;;  %410 = vst.msk [vmem:[#allocation2 + $0x159] sm:$0xff] %vm382_vm0, %v376_v38  ;;  %v2650_v47 = vpack.i.bf16 %v577_v37, %v575_v33  ;;  %vm1202_vm5 = vcmask 130048   ;;  %vm1211_vm6 = vcmask 195584  }
  0x3e   : > { %v273_v43 = vld [vmem:[%s3273_s27 + $0xa0] sm:$0xff]  ;;  %v274_v44 = vld [vmem:[%s3273_s27 + $0xa8] sm:$0xff]  ;;  %v587_v49 = vld [vmem:[#allocation2 + $0x30] ss:$2 sm:$0xff]  ;;  %vm301_vm10 = vcmp.gt.f32.partialorder %v269_v39, 0.0  ;;  %vm302_vm11 = vcmp.gt.f32.partialorder %v270_v40, 0.0 }
  0x3f   : > { %2611 = vrot.lane.b32.xlu1 %v2610_v0, %s3069_s30  ;;  %2606 = vrot.lane.b32.xlu0 %v2605_v1, %s3069_s30  ;;  %v571_v45 = vld [vmem:[#allocation2 + $0x1b] ss:$2 sm:$0xff]  ;;  %v573_v46 = vld [vmem:[#allocation2 + $0x4b] ss:$2 sm:$0xff]  ;;  %v589_v50 = vld [vmem:[#allocation2 + $0x60] ss:$2 sm:$0xff] }
  0x40   : > { %v484_v48 = vld [vmem:[#allocation2 + $0xc1] ss:$2 sm:$0xff]  ;;  %vm305_vm12 = vcmp.gt.f32.partialorder %v273_v43, 0.0  ;;  %vm306_vm13 = vcmp.gt.f32.partialorder %v274_v44, 0.0  ;;  %v2645_v51 = vpack.i.bf16 %v573_v46, %v571_v45  ;;  %v333_v52 = vmul.f32 0.2, %v269_v39 }
  0x41   : > { %v334_v53 = vmul.f32 0.2, %v270_v40  ;;  %v337_v54 = vmul.f32 0.2, %v273_v43  ;;  %v486_v55 = vld [vmem:[#allocation2 + $0xf1] ss:$2 sm:$0xff]  ;;  %v2655_v3 = vpack.i.bf16 %v589_v50, %v587_v49 }
  0x42   : > { %v338_v56 = vmul.f32 0.2, %v274_v44  ;;  %v277_v57 = vld [vmem:[%s3273_s27 + $0xc0] sm:$0xff]  ;;  %v365_v58 = vsel %vm301_vm10, %v269_v39, %v333_v52  ;;  %v278_v61 = vld [vmem:[%s3273_s27 + $0xc8] sm:$0xff]  ;;  %v603_v62 = vld [vmem:[#allocation2 + $0x31] ss:$2 sm:$0xff]  ;;  %v2660_v2 = vpack.i.bf16 %v486_v55, %v484_v48 }
  0x43   : > { %2621 = vrot.lane.b32.xlu1 %v2620_v12, %s3070_s7  ;;  %2616 = vrot.lane.b32.xlu0 %v2615_v21, %s3070_s7  ;;  %v366_v59 = vsel %vm302_vm11, %v270_v40, %v334_v53  ;;  %v369_v60 = vsel %vm305_vm12, %v273_v43, %v337_v54  ;;  %v605_v63 = vld [vmem:[#allocation2 + $0x61] ss:$2 sm:$0xff]  ;;  %v591_v0 = vld [vmem:[#allocation2 + $0x90] ss:$2 sm:$0xff]  ;;  %399 = vst.msk [vmem:[#allocation2 + $0xd9] sm:$0xff] %vm382_vm0, %v365_v58  ;;  %vm309_vm14 = vcmp.gt.f32.partialorder %v277_v57, 0.0 }
  0x44   : > { %v370_v1 = vsel %vm306_vm13, %v274_v44, %v338_v56  ;;  %400 = vst.msk [vmem:[#allocation2 + $0xe1] sm:$0xff] %vm382_vm0, %v366_v59  ;;  %403 = vst.msk [vmem:[#allocation2 + $0x109] sm:$0xff] %vm382_vm0, %v369_v60  ;;  %v593_v4 = vld [vmem:[#allocation2 + $0xc0] ss:$2 sm:$0xff]  ;;  %vm310_vm15 = vcmp.gt.f32.partialorder %v278_v61, 0.0  ;;  %v2670_v11 = vpack.i.bf16 %v605_v63, %v603_v62  ;;  %v283_v21 = vld [vmem:[%s3273_s27 + $0xf0] sm:$0xff] }
  0x45   : > { %404 = vst.msk [vmem:[#allocation2 + $0x111] sm:$0xff] %vm382_vm0, %v370_v1  ;;  %v281_v5 = vld [vmem:[%s3273_s27 + $0xe0] sm:$0xff]  ;;  %v282_v6 = vld [vmem:[%s3273_s27 + $0xe8] sm:$0xff]  ;;  %v341_v7 = vmul.f32 0.2, %v277_v57  ;;  %v2665_v12 = vpack.i.bf16 %v593_v4, %v591_v0  ;;  %v284_v28 = vld [vmem:[%s3273_s27 + $0xf8] sm:$0xff] }
  0x46   : > { %vm313_vm1 = vcmp.gt.f32.partialorder %v281_v5, 0.0  ;;  %vm314_vm2 = vcmp.gt.f32.partialorder %v282_v6, 0.0  ;;  %v342_v8 = vmul.f32 0.2, %v278_v61  ;;  %v345_v9 = vmul.f32 0.2, %v281_v5 }
  0x47   : > { %2631 = vrot.lane.b32.xlu1 %v2630_v22, %s3071_s8  ;;  %2626 = vrot.lane.b32.xlu0 %v2625_v26, %s3071_s8  ;;  %v346_v10 = vmul.f32 0.2, %v282_v6  ;;  %v373_v13 = vsel %vm309_vm14, %v277_v57, %v341_v7  ;;  %v500_v14 = vld [vmem:[#allocation2 + $0xc2] ss:$2 sm:$0xff]  ;;  %v502_v18 = vld [vmem:[#allocation2 + $0xf2] ss:$2 sm:$0xff] }
  0x48   : > { %v374_v15 = vsel %vm310_vm15, %v278_v61, %v342_v8  ;;  %v377_v16 = vsel %vm313_vm1, %v281_v5, %v345_v9  ;;  %407 = vst.msk [vmem:[#allocation2 + $0x139] sm:$0xff] %vm382_vm0, %v373_v13  ;;  %v488_v19 = vld [vmem:[#allocation2 + $0x121] ss:$2 sm:$0xff]  ;;  %v490_v20 = vld [vmem:[#allocation2 + $0x151] ss:$2 sm:$0xff]  ;;  %v2680_v22 = vpack.i.bf16 %v502_v18, %v500_v14  ;;  %vm315_vm3 = vcmp.gt.f32.partialorder %v283_v21, 0.0 }
  0x49   : > { %v378_v17 = vsel %vm314_vm2, %v282_v6, %v346_v10  ;;  %408 = vst.msk [vmem:[#allocation2 + $0x141] sm:$0xff] %vm382_vm0, %v374_v15  ;;  %411 = vst.msk [vmem:[#allocation2 + $0x169] sm:$0xff] %vm382_vm0, %v377_v16  ;;  %v2675_v23 = vpack.i.bf16 %v490_v20, %v488_v19  ;;  %v619_v24 = vld [vmem:[#allocation2 + $0x32] ss:$2 sm:$0xff]  ;;  %v621_v25 = vld [vmem:[#allocation2 + $0x62] ss:$2 sm:$0xff] }
  0x4a   : > { %412 = vst.msk [vmem:[#allocation2 + $0x171] sm:$0xff] %vm382_vm0, %v378_v17  ;;  %v607_v26 = vld [vmem:[#allocation2 + $0x91] ss:$2 sm:$0xff]  ;;  %v609_v27 = vld [vmem:[#allocation2 + $0xc1] ss:$2 sm:$0xff]  ;;  %vm316_vm4 = vcmp.gt.f32.partialorder %v284_v28, 0.0  ;;  %v2690_v31 = vpack.i.bf16 %v621_v25, %v619_v24 }
  0x4b   : > { %2641 = vrot.lane.b32.xlu1 %v2640_v41, %s3072_s9  ;;  %2636 = vrot.lane.b32.xlu0 %v2635_v42, %s3072_s9  ;;  %v347_v29 = vmul.f32 0.2, %v283_v21  ;;  %v348_v30 = vmul.f32 0.2, %v284_v28  ;;  %v2685_v32 = vpack.i.bf16 %v609_v27, %v607_v26  ;;  %v516_v33 = vld [vmem:[#allocation2 + $0xc3] ss:$2 sm:$0xff] }
  0x4c   : > { %v518_v35 = vld [vmem:[#allocation2 + $0xf3] ss:$2 sm:$0xff]  ;;  %v504_v36 = vld [vmem:[#allocation2 + $0x122] ss:$2 sm:$0xff]  ;;  %v506_v37 = vld [vmem:[#allocation2 + $0x152] ss:$2 sm:$0xff] }
  0x4d   : > { %v379_v34 = vsel %vm315_vm3, %v283_v21, %v347_v29  ;;  %v380_v38 = vsel %vm316_vm4, %v284_v28, %v348_v30  ;;  %v2700_v39 = vpack.i.bf16 %v518_v35, %v516_v33  ;;  %v2695_v40 = vpack.i.bf16 %v506_v37, %v504_v36  ;;  %v635_v41 = vld [vmem:[#allocation2 + $0x33] ss:$2 sm:$0xff]  ;;  %v637_v42 = vld [vmem:[#allocation2 + $0x63] ss:$2 sm:$0xff]  ;;  %v623_v43 = vld [vmem:[#allocation2 + $0x92] ss:$2 sm:$0xff] }
  0x4e   : > { %413 = vst.msk [vmem:[#allocation2 + $0x181] sm:$0xff] %vm382_vm0, %v379_v34  ;;  %414 = vst.msk [vmem:[#allocation2 + $0x189] sm:$0xff] %vm382_vm0, %v380_v38  ;;  %v625_v44 = vld [vmem:[#allocation2 + $0xc2] ss:$2 sm:$0xff]  ;;  %v2710_v45 = vpack.i.bf16 %v637_v42, %v635_v41  ;;  %v522_v50 = vld [vmem:[#allocation2 + $0x153] ss:$2 sm:$0xff] }
  0x4f   : > { %2651 = vrot.lane.b32.xlu1 %v2650_v47, %s3073_s10  ;;  %2646 = vrot.lane.b32.xlu0 %v2645_v51, %s3073_s10  ;;  %v2705_v46 = vpack.i.bf16 %v625_v44, %v623_v43  ;;  %v520_v47 = vld [vmem:[#allocation2 + $0x123] ss:$2 sm:$0xff]  ;;  %v531_v48 = vld [vmem:[#allocation2 + $0xd8] ss:$2 sm:$0xff]  ;;  %v533_v49 = vld [vmem:[#allocation2 + $0x108] ss:$2 sm:$0xff] }
  0x50   : > { %v2720_v51 = vpack.i.bf16 %v533_v49, %v531_v48  ;;  %v2715_v52 = vpack.i.bf16 %v522_v50, %v520_v47  ;;  %v651_v53 = vld [vmem:[#allocation2 + $0x48] ss:$2 sm:$0xff]  ;;  %v653_v54 = vld [vmem:[#allocation2 + $0x78] ss:$2 sm:$0xff]  ;;  %v639_v55 = vld [vmem:[#allocation2 + $0x93] ss:$2 sm:$0xff] }
  0x51   : > { %v641_v56 = vld [vmem:[#allocation2 + $0xc3] ss:$2 sm:$0xff]  ;;  %v3045_v57 = vld [vmem:[%s4009_s1 + $0x38] sm:$0xff]   ;;  %v2730_v58 = vpack.i.bf16 %v653_v54, %v651_v53  ;;  %v537_v63 = vld [vmem:[#allocation2 + $0x168] ss:$2 sm:$0xff]  ;;  %vm1220_vm7 = vcmask 261120  }
  0x52   : > { %v2725_v59 = vpack.i.bf16 %v641_v56, %v639_v55  ;;  %v547_v60 = vld [vmem:[#allocation2 + $0xd9] ss:$2 sm:$0xff]  ;;  %v549_v61 = vld [vmem:[#allocation2 + $0x109] ss:$2 sm:$0xff]  ;;  %v535_v62 = vld [vmem:[#allocation2 + $0x138] ss:$2 sm:$0xff]  ;;  %2507 = vmatprep.subr.bf16.mxu0 %v3045_v57 }
  0x53   : > { %2661 = vrot.lane.b32.xlu1 %v2660_v2, %s3068_s29  ;;  %2656 = vrot.lane.b32.xlu0 %v2655_v3, %s3074_s11  ;;  %v3046_v0 = vld [vmem:[%s4009_s1 + $0x30] sm:$0xff]   ;;  %v3047_v1 = vld [vmem:[%s4009_s1 + $0x28] sm:$0xff]   ;;  %v669_v3 = vld [vmem:[#allocation2 + $0x79] ss:$2 sm:$0xff]  ;;  %v2740_v5 = vpack.i.bf16 %v549_v61, %v547_v60  ;;  %v2735_v6 = vpack.i.bf16 %v537_v63, %v535_v62  ;;  %vm1229_vm8 = vcmask 326656   ;;  %vm1238_vm9 = vcmask 392192  }
  0x54   : > { %2508 = vmatpush3.bf16.msra.mxu0 %v3045_v57  ;;  %v667_v2 = vld [vmem:[#allocation2 + $0x49] ss:$2 sm:$0xff]  ;;  %v655_v4 = vld [vmem:[#allocation2 + $0xa8] ss:$2 sm:$0xff]  ;;  %v657_v7 = vld [vmem:[#allocation2 + $0xd8] ss:$2 sm:$0xff] }
  0x55   : > { %2509 = vmatprep.subr.bf16.mxu0 %v3046_v0  ;;  %v3048_v8 = vld [vmem:[%s4009_s1 + $0x20] sm:$0xff]   ;;  %v2750_v9 = vpack.i.bf16 %v669_v3, %v667_v2  ;;  %v2745_v10 = vpack.i.bf16 %v657_v7, %v655_v4  ;;  %v553_v14 = vld [vmem:[#allocation2 + $0x169] ss:$2 sm:$0xff]  ;;  %v3049_v15 = vld [vmem:[%s4009_s1 + $0x18] sm:$0xff]   ;;  %vm1247_vm10 = vcmask 457728   ;;  %vm1256_vm11 = vcmask 523264  }
  0x56   : > { %v551_v13 = vld [vmem:[#allocation2 + $0x139] ss:$2 sm:$0xff]  ;;  %v683_v18 = vld [vmem:[#allocation2 + $0x4a] ss:$2 sm:$0xff]  ;;  %v685_v19 = vld [vmem:[#allocation2 + $0x7a] ss:$2 sm:$0xff] }
  0x57   : > { %2671 = vrot.lane.b32.xlu1 %v2670_v11, %s3075_s12  ;;  %2666 = vrot.lane.b32.xlu0 %v2665_v12, %s3074_s11  ;;  %v563_v11 = vld [vmem:[#allocation2 + $0xda] ss:$2 sm:$0xff]  ;;  %v565_v12 = vld [vmem:[#allocation2 + $0x10a] ss:$2 sm:$0xff]  ;;  %v2755_v17 = vpack.i.bf16 %v553_v14, %v551_v13  ;;  %v671_v20 = vld [vmem:[#allocation2 + $0xa9] ss:$2 sm:$0xff] }
  0x58   : > { %2510 = vmatpush3.bf16.msra.mxu0 %v3046_v0  ;;  %v2760_v16 = vpack.i.bf16 %v565_v12, %v563_v11  ;;  %v673_v21 = vld [vmem:[#allocation2 + $0xd9] ss:$2 sm:$0xff]  ;;  %v567_v27 = vld [vmem:[#allocation2 + $0x13a] ss:$2 sm:$0xff]  ;;  %v569_v28 = vld [vmem:[#allocation2 + $0x16a] ss:$2 sm:$0xff] }
  0x59   : > { %2511 = vmatprep.subr.bf16.mxu0 %v3047_v1  ;;  %v2765_v24 = vpack.i.bf16 %v673_v21, %v671_v20  ;;  %v579_v25 = vld [vmem:[#allocation2 + $0xdb] ss:$2 sm:$0xff]  ;;  %v581_v26 = vld [vmem:[#allocation2 + $0x10b] ss:$2 sm:$0xff]  ;;  %v687_v34 = vld [vmem:[#allocation2 + $0xaa] ss:$2 sm:$0xff] }
  0x5a   : > { %v3051_v29 = vld [vmem:[%s4009_s1 + $0x8] sm:$0xff]   ;;  %v2780_v30 = vpack.i.bf16 %v581_v26, %v579_v25  ;;  %v3052_v36 = vld [vmem:[%s4009_s1] sm:$0xff]   ;;  %v611_v53 = vld [vmem:[#allocation2 + $0xf1] ss:$2 sm:$0xff]  ;;  %vm1265_vm12 = vcmask 588800   ;;  %vm1274_vm13 = vcmask 654336  }
  0x5b   : > { %2681 = vrot.lane.b32.xlu1 %v2680_v22, %s3067_s28  ;;  %2676 = vrot.lane.b32.xlu0 %v2675_v23, %s3068_s29  ;;  %v3050_v22 = vld [vmem:[%s4009_s1 + $0x10] sm:$0xff]   ;;  %v2770_v23 = vpack.i.bf16 %v685_v19, %v683_v18  ;;  %v701_v33 = vld [vmem:[#allocation2 + $0x7b] ss:$2 sm:$0xff]  ;;  %v689_v35 = vld [vmem:[#allocation2 + $0xda] ss:$2 sm:$0xff]  ;;  %vm1283_vm14 = vcmask 719872  }
  0x5c   : > { %2512 = vmatpush3.bf16.msra.mxu0 %v3047_v1  ;;  %v2785_v38 = vpack.i.bf16 %v689_v35, %v687_v34  ;;  %v583_v41 = vld [vmem:[#allocation2 + $0x13b] ss:$2 sm:$0xff]  ;;  %v585_v42 = vld [vmem:[#allocation2 + $0x16b] ss:$2 sm:$0xff]  ;;  %v631_v57 = vld [vmem:[#allocation2 + $0x152] ss:$2 sm:$0xff] }
  0x5d   : > { %2513 = vmatprep.subr.bf16.mxu0 %v3048_v8  ;;  %v2795_v44 = vpack.i.bf16 %v585_v42, %v583_v41  ;;  %v703_v47 = vld [vmem:[#allocation2 + $0xab] ss:$2 sm:$0xff]  ;;  %v705_v48 = vld [vmem:[#allocation2 + $0xdb] ss:$2 sm:$0xff]  ;;  %v629_v60 = vld [vmem:[#allocation2 + $0x122] ss:$2 sm:$0xff] }
  0x5e   : > { %v2805_v50 = vpack.i.bf16 %v705_v48, %v703_v47  ;;  %v613_v54 = vld [vmem:[#allocation2 + $0x121] ss:$2 sm:$0xff]  ;;  %v659_v7 = vld [vmem:[#allocation2 + $0x108] ss:$2 sm:$0xff]  ;;  %vm1292_vm15 = vcmask 785408   ;;  %vm1301_vm1 = vcmask 850944  }
  0x5f   : > { %2691 = vrot.lane.b32.xlu1 %v2690_v31, %s3076_s13  ;;  %2686 = vrot.lane.b32.xlu0 %v2685_v32, %s3075_s12  ;;  %v2775_v31 = vpack.i.bf16 %v569_v28, %v567_v27  ;;  %v699_v32 = vld [vmem:[#allocation2 + $0x4b] ss:$2 sm:$0xff]  ;;  %v2815_v56 = vpack.i.bf16 %v613_v54, %v611_v53  ;;  %v697_v18 = vld [vmem:[#allocation2 + $0x19a] ss:$2 sm:$0xff]  ;;  %v691_v19 = vld [vmem:[#allocation2 + $0x10a] ss:$2 sm:$0xff] }
  0x60   : > { %2514 = vmatpush3.bf16.msra.mxu0 %v3048_v8  ;;  %v2790_v37 = vpack.i.bf16 %v701_v33, %v699_v32  ;;  %v647_v63 = vld [vmem:[#allocation2 + $0x153] ss:$2 sm:$0xff]  ;;  %v649_v0 = vld [vmem:[#allocation2 + $0x183] ss:$2 sm:$0xff]  ;;  %v661_v8 = vld [vmem:[#allocation2 + $0x138] ss:$2 sm:$0xff] }
  0x61   : > { %2515 = vmatprep.subr.bf16.mxu0 %v3049_v15  ;;  %v643_v1 = vld [vmem:[#allocation2 + $0xf3] ss:$2 sm:$0xff]  ;;  %v645_v2 = vld [vmem:[#allocation2 + $0x123] ss:$2 sm:$0xff]  ;;  %v2840_v3 = vpack.i.bf16 %v649_v0, %v647_v63  ;;  %v693_v20 = vld [vmem:[#allocation2 + $0x13a] ss:$2 sm:$0xff] }
  0x62   : > { %v2835_v4 = vpack.i.bf16 %v645_v2, %v643_v1  ;;  %v679_v11 = vld [vmem:[#allocation2 + $0x169] ss:$2 sm:$0xff]  ;;  %v681_v12 = vld [vmem:[#allocation2 + $0x199] ss:$2 sm:$0xff]  ;;  %v462_v32 = vld [vmem:[#allocation2 + $0x30] ss:$2 sm:$0xff] }
  0x63   : > { %2701 = vrot.lane.b32.xlu1 %v2700_v39, %s3069_s30  ;;  %2696 = vrot.lane.b32.xlu0 %v2695_v40, %s3067_s28  ;;  %v595_v39 = vld [vmem:[#allocation2 + $0xf0] ss:$2 sm:$0xff]  ;;  %v597_v40 = vld [vmem:[#allocation2 + $0x120] ss:$2 sm:$0xff]  ;;  %v675_v13 = vld [vmem:[#allocation2 + $0x109] ss:$2 sm:$0xff] }
  0x64   : > { %2516 = vmatpush3.bf16.msra.mxu0 %v3049_v15  ;;  %v2800_v43 = vpack.i.bf16 %v597_v40, %v595_v39  ;;  %v677_v14 = vld [vmem:[#allocation2 + $0x139] ss:$2 sm:$0xff]  ;;  %v2860_v15 = vpack.i.bf16 %v681_v12, %v679_v11  ;;  %v464_v40 = vld [vmem:[#allocation2 + $0x60] ss:$2 sm:$0xff]  ;;  %v466_v41 = vld [vmem:[#allocation2 + $0x90] ss:$2 sm:$0xff] }
  0x65   : > { %2517 = vmatprep.subr.bf16.mxu0 %v3050_v22  ;;  %v707_v25 = vld [vmem:[#allocation2 + $0x10b] ss:$2 sm:$0xff]  ;;  %v709_v26 = vld [vmem:[#allocation2 + $0x13b] ss:$2 sm:$0xff]  ;;  %vm1310_vm2 = vcmask 916480   ;;  %vm1319_vm3 = vcmask 982016  }
  0x66   : > { %v2875_v28 = vpack.i.bf16 %v709_v26, %v707_v25 }
  0x67   : > { %2711 = vrot.lane.b32.xlu1 %v2710_v45, %s3077_s14  ;;  %2706 = vrot.lane.b32.xlu0 %v2705_v46, %s3076_s13  ;;  %v599_v45 = vld [vmem:[#allocation2 + $0x150] ss:$2 sm:$0xff]  ;;  %v601_v46 = vld [vmem:[#allocation2 + $0x180] ss:$2 sm:$0xff] }
  0x68   : > { %2518 = vmatpush3.bf16.msra.mxu0 %v3050_v22  ;;  %v2810_v49 = vpack.i.bf16 %v601_v46, %v599_v45  ;;  %v2865_v22 = vpack.i.bf16 %v693_v20, %v691_v19 }
  0x69   : > { %2519 = vmatprep.subr.bf16.mxu0 %v3051_v29 }
  0x6b   : > { %2721 = vrot.lane.b32.xlu1 %v2720_v51, %s3070_s7  ;;  %2716 = vrot.lane.b32.xlu0 %v2715_v52, %s3069_s30  ;;  %v615_v51 = vld [vmem:[#allocation2 + $0x151] ss:$2 sm:$0xff]  ;;  %v617_v52 = vld [vmem:[#allocation2 + $0x181] ss:$2 sm:$0xff] }
  0x6c   : > { %2520 = vmatpush3.bf16.msra.mxu0 %v3051_v29  ;;  %v2820_v55 = vpack.i.bf16 %v617_v52, %v615_v51 }
  0x6d   : > { %2521 = vmatprep.subr.bf16.mxu0 %v3052_v36 }
  0x6f   : > { %2731 = vrot.lane.b32.xlu1 %v2730_v58, %s3078_s23  ;;  %2726 = vrot.lane.b32.xlu0 %v2725_v59, %s3077_s14  ;;  %v633_v58 = vld [vmem:[#allocation2 + $0x182] ss:$2 sm:$0xff]  ;;  %v627_v59 = vld [vmem:[#allocation2 + $0xf2] ss:$2 sm:$0xff] }
  0x70   : > { %2522 = vmatpush3.bf16.msra.mxu0 %v3052_v36  ;;  %v2830_v61 = vpack.i.bf16 %v633_v58, %v631_v57  ;;  %v2825_v62 = vpack.i.bf16 %v629_v60, %v627_v59 }
  0x73   : > { %2741 = vrot.lane.b32.xlu1 %v2740_v5, %s3071_s8  ;;  %2736 = vrot.lane.b32.xlu0 %v2735_v6, %s3070_s7  ;;  %v663_v5 = vld [vmem:[#allocation2 + $0x168] ss:$2 sm:$0xff]  ;;  %v665_v6 = vld [vmem:[#allocation2 + $0x198] ss:$2 sm:$0xff] }
  0x77   : > { %2751 = vrot.lane.b32.xlu1 %v2750_v9, %s3079_s16  ;;  %2746 = vrot.lane.b32.xlu0 %v2745_v10, %s3078_s23  ;;  %v2850_v9 = vpack.i.bf16 %v665_v6, %v663_v5  ;;  %v2845_v10 = vpack.i.bf16 %v661_v8, %v659_v7 }
  0x7b   : > { %2761 = vrot.lane.b32.xlu1 %v2760_v16, %s3072_s9  ;;  %2756 = vrot.lane.b32.xlu0 %v2755_v17, %s3071_s8  ;;  %v2855_v16 = vpack.i.bf16 %v677_v14, %v675_v13  ;;  %v695_v17 = vld [vmem:[#allocation2 + $0x16a] ss:$2 sm:$0xff] }
  0x7c   : > { %v2870_v21 = vpack.i.bf16 %v697_v18, %v695_v17  ;;  %v468_v13 = vld [vmem:[#allocation2 + $0xc0] ss:$2 sm:$0xff]  ;;  %v470_v14 = vld [vmem:[#allocation2 + $0xf0] ss:$2 sm:$0xff] }
  0x7f   : > { %2771 = vrot.lane.b32.xlu1 %v2770_v23, %s3080_s24  ;;  %2766 = vrot.lane.b32.xlu0 %v2765_v24, %s3079_s16  ;;  %v711_v23 = vld [vmem:[#allocation2 + $0x16b] ss:$2 sm:$0xff]  ;;  %v713_v24 = vld [vmem:[#allocation2 + $0x19b] ss:$2 sm:$0xff] }
  0x80   : > { %v2880_v27 = vpack.i.bf16 %v713_v24, %v711_v23 }
  0x83   : > { %2781 = vrot.lane.b32.xlu1 %v2780_v30, %s3073_s10  ;;  %2776 = vrot.lane.b32.xlu0 %v2775_v31, %s3072_s9  ;;  %v460_v30 = vld [vmem:[#allocation2] ss:$2 sm:$0xff] }
  0x87   : > { %2791 = vrot.lane.b32.xlu1 %v2790_v37, %s3081_s15  ;;  %2786 = vrot.lane.b32.xlu0 %v2785_v38, %s3080_s24 }
  0x8b   : > { %2801 = vrot.lane.b32.xlu1 %v2800_v43, %s3074_s11  ;;  %2796 = vrot.lane.b32.xlu0 %v2795_v44, %s3073_s10 }
  0x8f   : > { %2811 = vrot.lane.b32.xlu1 %v2810_v49, %s3074_s11  ;;  %2806 = vrot.lane.b32.xlu0 %v2805_v50, %s3081_s15 }
  0x93   : > { %2821 = vrot.lane.b32.xlu1 %v2820_v55, %s3075_s12  ;;  %2816 = vrot.lane.b32.xlu0 %v2815_v56, %s3075_s12 }
  0x97   : > { %2831 = vrot.lane.b32.xlu1 %v2830_v61, %s3076_s13  ;;  %2826 = vrot.lane.b32.xlu0 %v2825_v62, %s3076_s13 }
  0x9b   : > { %2841 = vrot.lane.b32.xlu1 %v2840_v3, %s3077_s14  ;;  %2836 = vrot.lane.b32.xlu0 %v2835_v4, %s3077_s14 }
  0x9f   : > { %2851 = vrot.lane.b32.xlu1 %v2850_v9, %s3078_s23  ;;  %2846 = vrot.lane.b32.xlu0 %v2845_v10, %s3078_s23 }
  0xa3   : > { %2861 = vrot.lane.b32.xlu1 %v2860_v15, %s3079_s16  ;;  %2856 = vrot.lane.b32.xlu0 %v2855_v16, %s3079_s16 }
  0xa7   : > { %2871 = vrot.lane.b32.xlu1 %v2870_v21, %s3080_s24  ;;  %2866 = vrot.lane.b32.xlu0 %v2865_v22, %s3080_s24 }
  0xa9   : > { %v2597_v29 = vpop.permute.xlu1 %2596  ;;  %v2587_v31 = vpop.permute.xlu0 %2586 }
  0xaa   : > { %v2599_v33 = vunpack.i.h.bf16 %v2597_v29  ;;  %v2598_v34 = vunpack.i.l.bf16 %v2597_v29  ;;  %v2589_v35 = vunpack.i.h.bf16 %v2587_v31  ;;  %v2588_v36 = vunpack.i.l.bf16 %v2587_v31 }
  0xab   : > { %2881 = vrot.lane.b32.xlu1 %v2880_v27, %s3081_s15  ;;  %2876 = vrot.lane.b32.xlu0 %v2875_v28, %s3081_s15 }
  0xac   : > { %v1194_v37 = vsel %vm382_vm0, %v460_v30, %v2588_v36  ;;  %v1195_v38 = vsel %vm382_vm0, %v462_v32, %v2589_v35 }
  0xad   : > { %v2602_v39 = vpop.permute.xlu1 %2601  ;;  %v2592_v42 = vpop.permute.xlu0 %2591  ;;  %v3437_v43 = vsel %vm1202_vm5, %v1194_v37, %v2598_v34  ;;  %v3440_v44 = vsel %vm1202_vm5, %v1195_v38, %v2599_v33 }
  0xae   : > { %v2604_v45 = vunpack.i.h.bf16 %v2602_v39  ;;  %v2603_v46 = vunpack.i.l.bf16 %v2602_v39  ;;  %v2594_v47 = vunpack.i.h.bf16 %v2592_v42  ;;  %v2593_v48 = vunpack.i.l.bf16 %v2592_v42 }
  0xb0   : > { %v1197_v49 = vsel %vm382_vm0, %v466_v41, %v2594_v47  ;;  %v1196_v50 = vsel %vm382_vm0, %v464_v40, %v2593_v48 }
  0xb1   : > { %v2612_v51 = vpop.permute.xlu1 %2611  ;;  %v1205_v52 = vsel %vm1202_vm5, %v1196_v50, %v2603_v46  ;;  %v1206_v53 = vsel %vm1202_vm5, %v1197_v49, %v2604_v45  ;;  %v3446_v54 = vpop.permute.xlu0 %2606 }
  0xb2   : > { %v2614_v55 = vunpack.i.h.bf16 %v2612_v51  ;;  %v2613_v56 = vunpack.i.l.bf16 %v2612_v51  ;;  %v2609_v35 = vunpack.i.h.bf16 %v3446_v54  ;;  %v2608_v36 = vunpack.i.l.bf16 %v3446_v54 }
  0xb4   : > { %v1214_v57 = vsel %vm1211_vm6, %v1205_v52, %v2613_v56  ;;  %v1215_v58 = vsel %vm1211_vm6, %v1206_v53, %v2614_v55  ;;  %v1212_v48 = vsel %vm1211_vm6, %v3437_v43, %v2608_v36  ;;  %v1213_v49 = vsel %vm1211_vm6, %v3440_v44, %v2609_v35 }
  0xb5   : > { %v2622_v59 = vpop.permute.xlu1 %2621  ;;  %v3450_v60 = vpop.permute.xlu0 %2616 }
  0xb6   : > { %v2624_v61 = vunpack.i.h.bf16 %v2622_v59  ;;  %v2623_v62 = vunpack.i.l.bf16 %v2622_v59  ;;  %v2619_v39 = vunpack.i.h.bf16 %v3450_v60  ;;  %v2618_v40 = vunpack.i.l.bf16 %v3450_v60 }
  0xb8   : > { %v3453_v63 = vsel %vm1220_vm7, %v1214_v57, %v2623_v62  ;;  %v3456_v0 = vsel %vm1220_vm7, %v1215_v58, %v2624_v61  ;;  %v1222_v54 = vsel %vm1220_vm7, %v1213_v49, %v2619_v39  ;;  %v1221_v55 = vsel %vm1220_vm7, %v1212_v48, %v2618_v40 }
  0xb9   : > { %v3458_v1 = vpop.permute.xlu1 %2631  ;;  %v3460_v2 = vpop.permute.xlu0 %2626 }
  0xba   : > { %v2634_v41 = vunpack.i.h.bf16 %v3458_v1  ;;  %v2633_v42 = vunpack.i.l.bf16 %v3458_v1  ;;  %v2629_v45 = vunpack.i.h.bf16 %v3460_v2  ;;  %v2628_v46 = vunpack.i.l.bf16 %v3460_v2 }
  0xbc   : > { %v1232_v44 = vsel %vm1229_vm8, %v3453_v63, %v2633_v42  ;;  %v1233_v57 = vsel %vm1229_vm8, %v3456_v0, %v2634_v41  ;;  %v1230_v60 = vsel %vm1229_vm8, %v1221_v55, %v2628_v46  ;;  %v1231_v61 = vsel %vm1229_vm8, %v1222_v54, %v2629_v45 }
  0xbd   : > { %v3462_v3 = vpop.permute.xlu1 %2641  ;;  %v3464_v4 = vpop.permute.xlu0 %2636 }
  0xbe   : > { %v2643_v47 = vunpack.i.l.bf16 %v3462_v3  ;;  %v2644_v50 = vunpack.i.h.bf16 %v3462_v3  ;;  %v2638_v51 = vunpack.i.l.bf16 %v3464_v4  ;;  %v2639_v56 = vunpack.i.h.bf16 %v3464_v4 }
  0xc0   : > { %v1241_v62 = vsel %vm1238_vm9, %v1232_v44, %v2643_v47  ;;  %v1242_v2 = vsel %vm1238_vm9, %v1233_v57, %v2644_v50  ;;  %v1239_v63 = vsel %vm1238_vm9, %v1230_v60, %v2638_v51 }
  0xc1   : > { %v3466_v5 = vpop.permute.xlu1 %2651  ;;  %v3468_v6 = vpop.permute.xlu0 %2646 }
  0xc2   : > { %v2653_v43 = vunpack.i.l.bf16 %v3466_v5  ;;  %v2654_v58 = vunpack.i.h.bf16 %v3466_v5  ;;  %v2648_v59 = vunpack.i.l.bf16 %v3468_v6  ;;  %v2649_v1 = vunpack.i.h.bf16 %v3468_v6 }
  0xc5   : > { %v2662_v7 = vpop.permute.xlu1 %2661  ;;  %v3470_v8 = vpop.permute.xlu0 %2656 }
  0xc6   : > { %v2664_v11 = vunpack.i.h.bf16 %v2662_v7  ;;  %v2663_v12 = vunpack.i.l.bf16 %v2662_v7  ;;  %v2659_v0 = vunpack.i.h.bf16 %v3470_v8  ;;  %v2658_v3 = vunpack.i.l.bf16 %v3470_v8 }
  0xc7   : > { %v1240_v7 = vsel %vm1238_vm9, %v1231_v61, %v2639_v56 }
  0xc8   : > { %v1199_v19 = vsel %vm382_vm0, %v470_v14, %v2664_v11  ;;  %v1198_v20 = vsel %vm382_vm0, %v468_v13, %v2663_v12  ;;  %v1250_v11 = vsel %vm1247_vm10, %v1241_v62, %v2653_v43  ;;  %v1251_v13 = vsel %vm1247_vm10, %v1242_v2, %v2654_v58 }
  0xc9   : > { %v3472_v9 = vpop.permute.xlu1 %2671  ;;  %v3474_v10 = vpop.permute.xlu0 %2666  ;;  %v1248_v14 = vsel %vm1247_vm10, %v1239_v63, %v2648_v59 }
  0xca   : > { %v2674_v12 = vunpack.i.h.bf16 %v3472_v9  ;;  %v2673_v6 = vunpack.i.l.bf16 %v3472_v9  ;;  %v1257_v35 = vsel %vm1256_vm11, %v1248_v14, %v2658_v3  ;;  %v2668_v50 = vunpack.i.l.bf16 %v3474_v10 }
  0xcd   : > { %v2682_v15 = vpop.permute.xlu1 %2681  ;;  %v3476_v16 = vpop.permute.xlu0 %2676 }
  0xce   : > { %v2684_v17 = vunpack.i.h.bf16 %v2682_v15  ;;  %v2683_v18 = vunpack.i.l.bf16 %v2682_v15 }
  0xd0   : > { %v3481_v21 = vsel %vm1202_vm5, %v1198_v20, %v2683_v18  ;;  %v3484_v22 = vsel %vm1202_vm5, %v1199_v19, %v2684_v17  ;;  %v1249_v17 = vsel %vm1247_vm10, %v1240_v7, %v2649_v1  ;;  %v2669_v18 = vunpack.i.h.bf16 %v3474_v10 }
  0xd1   : > { %v3486_v23 = vpop.permute.xlu1 %2691  ;;  %v3488_v24 = vpop.permute.xlu0 %2686  ;;  %v1258_v9 = vsel %vm1256_vm11, %v1249_v17, %v2659_v0 }
  0xd2   : > { %v2694_v15 = vunpack.i.h.bf16 %v3486_v23  ;;  %v2693_v8 = vunpack.i.l.bf16 %v3486_v23  ;;  %v1266_v23 = vsel %vm1265_vm12, %v1257_v35, %v2673_v6  ;;  %v1267_v42 = vsel %vm1265_vm12, %v1258_v9, %v2674_v12 }
  0xd3   : > { %v2689_v55 = vunpack.i.h.bf16 %v3488_v24  ;;  %v2688_v56 = vunpack.i.l.bf16 %v3488_v24  ;;  %v2679_v35 = vunpack.i.h.bf16 %v3476_v16  ;;  %v2678_v9 = vunpack.i.l.bf16 %v3476_v16 }
  0xd4   : > { %v1275_v46 = vsel %vm1274_vm13, %v1266_v23, %v2693_v8  ;;  %v1276_v47 = vsel %vm1274_vm13, %v1267_v42, %v2694_v15  ;;  %v472_v42 = vld [vmem:[#allocation2 + $0x120] ss:$2 sm:$0xff] }
  0xd5   : > { %v3490_v25 = vpop.permute.xlu1 %2701  ;;  %v3492_v26 = vpop.permute.xlu0 %2696 }
  0xd9   : > { %v3494_v27 = vpop.permute.xlu1 %2711  ;;  %v3496_v28 = vpop.permute.xlu0 %2706 }
  0xda   : > { %v2714_v19 = vunpack.i.h.bf16 %v3494_v27  ;;  %v2713_v20 = vunpack.i.l.bf16 %v3494_v27  ;;  %v2709_v61 = vunpack.i.h.bf16 %v3496_v28  ;;  %v2708_v62 = vunpack.i.l.bf16 %v3496_v28 }
  0xdc   : > { %v1284_v51 = vsel %vm1283_vm14, %v1275_v46, %v2713_v20  ;;  %v1285_v54 = vsel %vm1283_vm14, %v1276_v47, %v2714_v19 }
  0xdd   : > { %v3498_v29 = vpop.permute.xlu1 %2721  ;;  %v3500_v30 = vpop.permute.xlu0 %2716 }
  0xe1   : > { %v3502_v31 = vpop.permute.xlu1 %2731  ;;  %v3504_v32 = vpop.permute.xlu0 %2726 }
  0xe2   : > { %v2734_v36 = vunpack.i.h.bf16 %v3502_v31  ;;  %v2733_v39 = vunpack.i.l.bf16 %v3502_v31  ;;  %v1260_v31 = vsel %vm1256_vm11, %v1251_v13, %v2669_v18  ;;  %v2729_v2 = vunpack.i.h.bf16 %v3504_v32 }
  0xe3   : > { %v2728_v63 = vunpack.i.l.bf16 %v3504_v32  ;;  %v1269_v15 = vsel %vm1265_vm12, %v1260_v31, %v2689_v55  ;;  %v2698_v31 = vunpack.i.l.bf16 %v3492_v26 }
  0xe4   : > { %v1294_v43 = vsel %vm1292_vm15, %v1285_v54, %v2734_v36 }
  0xe5   : > { %v3506_v33 = vpop.permute.xlu1 %2741  ;;  %v3508_v34 = vpop.permute.xlu0 %2736 }
  0xe9   : > { %v3512_v37 = vpop.permute.xlu1 %2751  ;;  %v3514_v38 = vpop.permute.xlu0 %2746 }
  0xea   : > { %v2754_v45 = vunpack.i.h.bf16 %v3512_v37  ;;  %v2753_v27 = vunpack.i.l.bf16 %v3512_v37  ;;  %v1293_v37 = vsel %vm1292_vm15, %v1284_v51, %v2733_v39  ;;  %v2749_v7 = vunpack.i.h.bf16 %v3514_v38 }
  0xeb   : > { %v2748_v12 = vunpack.i.l.bf16 %v3514_v38 }
  0xec   : > { %v1302_v60 = vsel %vm1301_vm1, %v1293_v37, %v2753_v27  ;;  %v1303_v10 = vsel %vm1301_vm1, %v1294_v43, %v2754_v45  ;;  %v474_v45 = vld [vmem:[#allocation2 + $0x150] ss:$2 sm:$0xff] }
  0xed   : > { %v3529_v52 = vpop.permute.xlu1 %2761  ;;  %v3531_v53 = vpop.permute.xlu0 %2756  ;;  %v1201_v55 = vsel %vm382_vm0, %v474_v45, %v2679_v35 }
  0xf1   : > { %v2772_v4 = vpop.permute.xlu1 %2771  ;;  %v3551_v5 = vpop.permute.xlu0 %2766 }
  0xf2   : > { %v2774_v48 = vunpack.i.h.bf16 %v2772_v4  ;;  %v2773_v49 = vunpack.i.l.bf16 %v2772_v4  ;;  %v1259_v4 = vsel %vm1256_vm11, %v1250_v11, %v2668_v50  ;;  %v2769_v32 = vunpack.i.h.bf16 %v3551_v5 }
  0xf3   : > { %v1268_v14 = vsel %vm1265_vm12, %v1259_v4, %v2688_v56  ;;  %v2768_v8 = vunpack.i.l.bf16 %v3551_v5  ;;  %v1278_v11 = vsel %vm1274_vm13, %v1269_v15, %v2709_v61  ;;  %v1200_v56 = vsel %vm382_vm0, %v472_v42, %v2678_v9 }
  0xf4   : > { %v1311_v1 = vsel %vm1310_vm2, %v1302_v60, %v2773_v49  ;;  %v1312_v24 = vsel %vm1310_vm2, %v1303_v10, %v2774_v48  ;;  %v1277_v17 = vsel %vm1274_vm13, %v1268_v14, %v2708_v62  ;;  %v1287_v20 = vsel %vm1283_vm14, %v1278_v11, %v2729_v2 }
  0xf5   : > { %v3569_v40 = vpop.permute.xlu1 %2781  ;;  %v3571_v41 = vpop.permute.xlu0 %2776  ;;  %v1286_v38 = vsel %vm1283_vm14, %v1277_v17, %v2728_v63  ;;  %v1296_v39 = vsel %vm1292_vm15, %v1287_v20, %v2749_v7  ;;  %v2699_v49 = vunpack.i.h.bf16 %v3492_v26  ;;  %v2703_v26 = vunpack.i.l.bf16 %v3490_v25 }
  0xf6   : > { %v1295_v36 = vsel %vm1292_vm15, %v1286_v38, %v2748_v12  ;;  %v1305_v46 = vsel %vm1301_vm1, %v1296_v39, %v2769_v32  ;;  %v1209_v60 = vsel %vm1202_vm5, %v1200_v56, %v2698_v31  ;;  %v2724_v61 = vunpack.i.h.bf16 %v3498_v29 }
  0xf7   : > { %v1304_v27 = vsel %vm1301_vm1, %v1295_v36, %v2768_v8  ;;  %v1210_v10 = vsel %vm1202_vm5, %v1201_v55, %v2699_v49  ;;  %v2723_v62 = vunpack.i.l.bf16 %v3498_v29  ;;  %v2744_v2 = vunpack.i.h.bf16 %v3506_v33 }
  0xf8   : > { %v2759_v63 = vunpack.i.h.bf16 %v3531_v53  ;;  %v1216_v4 = vsel %vm1211_vm6, %v3481_v21, %v2703_v26  ;;  %v2763_v12 = vunpack.i.l.bf16 %v3529_v52 }
  0xf9   : > { %v2792_v44 = vpop.permute.xlu1 %2791  ;;  %v2787_v57 = vpop.permute.xlu0 %2786  ;;  %v1225_v14 = vsel %vm1220_vm7, %v1216_v4, %v2723_v62 }
  0xfa   : > { %v2794_v58 = vunpack.i.h.bf16 %v2792_v44  ;;  %v2793_v59 = vunpack.i.l.bf16 %v2792_v44  ;;  %v2789_v18 = vunpack.i.h.bf16 %v2787_v57  ;;  %v2788_v19 = vunpack.i.l.bf16 %v2787_v57 }
  0xfb   : > { %v2704_v57 = vunpack.i.h.bf16 %v3490_v25  ;;  %v2743_v25 = vunpack.i.l.bf16 %v3506_v33  ;;  %v2764_v33 = vunpack.i.h.bf16 %v3529_v52 }
  0xfc   : > { %v1320_v0 = vsel %vm1319_vm3, %v1311_v1, %v2793_v59  ;;  %v1321_v3 = vsel %vm1319_vm3, %v1312_v24, %v2794_v58  ;;  %v1313_v16 = vsel %vm1310_vm2, %v1304_v27, %v2788_v19  ;;  %v1314_v50 = vsel %vm1310_vm2, %v1305_v46, %v2789_v18 }
  0xfd   : > { %v3600_v6 = vpop.permute.xlu1 %2801  ;;  %v3602_v28 = vpop.permute.xlu0 %2796  ;;  %v1328_v13 = vpack.c.bf16 %v1321_v3, %v1320_v0  ;;  %v2719_v58 = vunpack.i.h.bf16 %v3500_v30  ;;  %v2718_v59 = vunpack.i.l.bf16 %v3500_v30  ;;  %v2739_v1 = vunpack.i.h.bf16 %v3508_v34 }
  0xfe   : > { %v2738_v24 = vunpack.i.l.bf16 %v3508_v34  ;;  %v2758_v30 = vunpack.i.l.bf16 %v3531_v53  ;;  %v1217_v29 = vsel %vm1211_vm6, %v3484_v22, %v2704_v57  ;;  %v2779_v53 = vunpack.i.h.bf16 %v3571_v41 }
  0xff   : > { %2523 = vmatprep.mubr.bf16.mxu0 %v1328_v13  ;;  %v1218_v34 = vsel %vm1211_vm6, %v1209_v60, %v2718_v59  ;;  %v1219_v7 = vsel %vm1211_vm6, %v1210_v10, %v2719_v58  ;;  %v2778_v13 = vunpack.i.l.bf16 %v3571_v41  ;;  %v1226_v15 = vsel %vm1220_vm7, %v1217_v29, %v2724_v61 }
 0x100   : > { %v1227_v21 = vsel %vm1220_vm7, %v1218_v34, %v2738_v24  ;;  %v1228_v22 = vsel %vm1220_vm7, %v1219_v7, %v2739_v1  ;;  %v1234_v32 = vsel %vm1229_vm8, %v1225_v14, %v2743_v25  ;;  %v1235_v8 = vsel %vm1229_vm8, %v1226_v15, %v2744_v2 }
 0x101   : > { %v3616_v5 = vpop.permute.xlu1 %2811  ;;  %v2807_v23 = vpop.permute.xlu0 %2806  ;;  %v1236_v17 = vsel %vm1229_vm8, %v1227_v21, %v2758_v30  ;;  %v1237_v52 = vsel %vm1229_vm8, %v1228_v22, %v2759_v63  ;;  %v2784_v41 = vunpack.i.h.bf16 %v3569_v40  ;;  %v2783_v19 = vunpack.i.l.bf16 %v3569_v40 }
 0x102   : > { %v2809_v47 = vunpack.i.h.bf16 %v2807_v23  ;;  %v2808_v48 = vunpack.i.l.bf16 %v2807_v23  ;;  %v2799_v38 = vunpack.i.h.bf16 %v3602_v28  ;;  %v2798_v20 = vunpack.i.l.bf16 %v3602_v28 }
 0x103   : > { %v1243_v35 = vsel %vm1238_vm9, %v1234_v32, %v2763_v12  ;;  %v1244_v9 = vsel %vm1238_vm9, %v1235_v8, %v2764_v33  ;;  %v1245_v36 = vsel %vm1238_vm9, %v1236_v17, %v2778_v13  ;;  %v1246_v39 = vsel %vm1238_vm9, %v1237_v52, %v2779_v53 }
 0x104   : > { %v1322_v51 = vsel %vm1319_vm3, %v1313_v16, %v2808_v48  ;;  %v1323_v54 = vsel %vm1319_vm3, %v1314_v50, %v2809_v47  ;;  %v2804_v23 = vunpack.i.h.bf16 %v3600_v6  ;;  %v2803_v42 = vunpack.i.l.bf16 %v3600_v6 }
 0x105   : > { %v3628_v37 = vpop.permute.xlu1 %2821  ;;  %v3630_v43 = vpop.permute.xlu0 %2816  ;;  %v1329_v44 = vpack.c.bf16 %v1323_v54, %v1322_v51  ;;  %v2814_v45 = vunpack.i.h.bf16 %v3616_v5  ;;  %v2813_v40 = vunpack.i.l.bf16 %v3616_v5  ;;  %v1252_v31 = vsel %vm1247_vm10, %v1243_v35, %v2783_v19 }
 0x106   : > { %v2824_v27 = vunpack.i.h.bf16 %v3628_v37  ;;  %v2823_v28 = vunpack.i.l.bf16 %v3628_v37  ;;  %v2819_v46 = vunpack.i.h.bf16 %v3630_v43  ;;  %v2818_v47 = vunpack.i.l.bf16 %v3630_v43 }
 0x107   : > { %2524 = vmatmul.mubr.bf16.vlgmr.msra.gmra.mxu0 %v1329_v44  ;;  %v1253_v16 = vsel %vm1247_vm10, %v1244_v9, %v2784_v41  ;;  %v1254_v6 = vsel %vm1247_vm10, %v1245_v36, %v2798_v20  ;;  %v1255_v50 = vsel %vm1247_vm10, %v1246_v39, %v2799_v38  ;;  %v1261_v56 = vsel %vm1256_vm11, %v1252_v31, %v2803_v42 }
 0x108   : > { %v1262_v37 = vsel %vm1256_vm11, %v1253_v16, %v2804_v23  ;;  %v1263_v43 = vsel %vm1256_vm11, %v1254_v6, %v2813_v40  ;;  %v1264_v44 = vsel %vm1256_vm11, %v1255_v50, %v2814_v45  ;;  %v1270_v59 = vsel %vm1265_vm12, %v1261_v56, %v2818_v47 }
 0x109   : > { %v3646_v0 = vpop.permute.xlu1 %2831  ;;  %v3648_v3 = vpop.permute.xlu0 %2826  ;;  %v1272_v57 = vsel %vm1265_vm12, %v1263_v43, %v2823_v28  ;;  %v1273_v26 = vsel %vm1265_vm12, %v1264_v44, %v2824_v27  ;;  %v1271_v58 = vsel %vm1265_vm12, %v1262_v37, %v2819_v46 }
 0x10a   : > { %v2834_v5 = vunpack.i.h.bf16 %v3646_v0  ;;  %v2833_v51 = vunpack.i.l.bf16 %v3646_v0  ;;  %v2829_v54 = vunpack.i.h.bf16 %v3648_v3  ;;  %v2828_v55 = vunpack.i.l.bf16 %v3648_v3 }
 0x10c   : > { %v1281_v2 = vsel %vm1274_vm13, %v1272_v57, %v2833_v51  ;;  %v1282_v25 = vsel %vm1274_vm13, %v1273_v26, %v2834_v5  ;;  %v1279_v63 = vsel %vm1274_vm13, %v1270_v59, %v2828_v55  ;;  %v1280_v30 = vsel %vm1274_vm13, %v1271_v58, %v2829_v54  ;;  %v3727_v5 = vld [vmem:[%s4010_s2] ss:$0 sm:$0xff] }
 0x10d   : > { %v2842_v11 = vpop.permute.xlu1 %2841  ;;  %v2837_v18 = vpop.permute.xlu0 %2836 }
 0x10e   : > { %v2844_v61 = vunpack.i.h.bf16 %v2842_v11  ;;  %v2843_v62 = vunpack.i.l.bf16 %v2842_v11  ;;  %v2839_v1 = vunpack.i.h.bf16 %v2837_v18  ;;  %v2838_v24 = vunpack.i.l.bf16 %v2837_v18 }
 0x110   : > { %v1290_v14 = vsel %vm1283_vm14, %v1281_v2, %v2843_v62  ;;  %v1291_v15 = vsel %vm1283_vm14, %v1282_v25, %v2844_v61  ;;  %v1288_v21 = vsel %vm1283_vm14, %v1279_v63, %v2838_v24  ;;  %v1289_v22 = vsel %vm1283_vm14, %v1280_v30, %v2839_v1  ;;  %v1534_v24 = vld [vmem:[#allocation3 + $0x1] sm:$0xff] }
 0x111   : > { %v2852_v48 = vpop.permute.xlu1 %2851  ;;  %v2847_v49 = vpop.permute.xlu0 %2846  ;;  %v1542_v63 = vld [vmem:[#allocation3 + $0x2] sm:$0xff] }
 0x112   : > { %v2854_v0 = vunpack.i.h.bf16 %v2852_v48  ;;  %v2853_v3 = vunpack.i.l.bf16 %v2852_v48  ;;  %v2849_v4 = vunpack.i.h.bf16 %v2847_v49  ;;  %v2848_v29 = vunpack.i.l.bf16 %v2847_v49 }
 0x114   : > { %v1299_v11 = vsel %vm1292_vm15, %v1290_v14, %v2853_v3  ;;  %v1300_v18 = vsel %vm1292_vm15, %v1291_v15, %v2854_v0  ;;  %v1297_v41 = vsel %vm1292_vm15, %v1288_v21, %v2848_v29  ;;  %v1298_v19 = vsel %vm1292_vm15, %v1289_v22, %v2849_v4  ;;  %v3053_v14 = vld [vmem:[%s4011_s3 + $0x20] ss:$0 sps:$4 sm:$0xff]  }
 0x115   : > { %v2862_v60 = vpop.permute.xlu1 %2861  ;;  %v2857_v10 = vpop.permute.xlu0 %2856 }
 0x116   : > { %v2864_v34 = vunpack.i.h.bf16 %v2862_v60  ;;  %v2863_v7 = vunpack.i.l.bf16 %v2862_v60  ;;  %v2859_v33 = vunpack.i.h.bf16 %v2857_v10  ;;  %v2858_v12 = vunpack.i.l.bf16 %v2857_v10 }
 0x118   : > { %v1308_v38 = vsel %vm1301_vm1, %v1299_v11, %v2863_v7  ;;  %v1309_v20 = vsel %vm1301_vm1, %v1300_v18, %v2864_v34  ;;  %v1306_v35 = vsel %vm1301_vm1, %v1297_v41, %v2858_v12  ;;  %v1307_v9 = vsel %vm1301_vm1, %v1298_v19, %v2859_v33  ;;  %v3055_v41 = vld [vmem:[%s4011_s3 + $0x10] sm:$0xff]  }
 0x119   : > { %v2872_v53 = vpop.permute.xlu1 %2871  ;;  %v2867_v13 = vpop.permute.xlu0 %2866  ;;  %vm1978_vm1 = vcmask 1043456  }
 0x11a   : > { %v2874_v32 = vunpack.i.h.bf16 %v2872_v53  ;;  %v2873_v8 = vunpack.i.l.bf16 %v2872_v53  ;;  %v2869_v17 = vunpack.i.h.bf16 %v2867_v13  ;;  %v2868_v52 = vunpack.i.l.bf16 %v2867_v13  ;;  %2559 = vmatprep.subr.msk.bf16.mxu1 %vm1978_vm1, %v3053_v14 }
 0x11c   : > { %v1317_v27 = vsel %vm1310_vm2, %v1308_v38, %v2873_v8  ;;  %v1318_v28 = vsel %vm1310_vm2, %v1309_v20, %v2874_v32  ;;  %v1315_v46 = vsel %vm1310_vm2, %v1306_v35, %v2868_v52  ;;  %v1316_v47 = vsel %vm1310_vm2, %v1307_v9, %v2869_v17  ;;  %v3054_v17 = vld [vmem:[%s4011_s3 + $0x18] sm:$0xff]  }
 0x11d   : > { %v2882_v36 = vpop.permute.xlu1 %2881  ;;  %v2877_v39 = vpop.permute.xlu0 %2876  ;;  %v1980_v32 = vsel %vm1978_vm1, %v3053_v14, 0  ;;  %v1590_v14 = vld [vmem:[#allocation3 + $0x91] sm:$0xff] }
 0x11e   : > { %v2884_v23 = vunpack.i.h.bf16 %v2882_v36  ;;  %v2883_v42 = vunpack.i.l.bf16 %v2882_v36  ;;  %v2879_v45 = vunpack.i.h.bf16 %v2877_v39  ;;  %v2878_v40 = vunpack.i.l.bf16 %v2877_v39  ;;  %2532 = vmatpush3.bf16.msra.mxu1 %v1980_v32 }
 0x11f   : > { %2533 = vmatprep.subr.bf16.mxu1 %v3054_v17 }
 0x120   : > { %v1324_v48 = vsel %vm1319_vm3, %v1315_v46, %v2878_v40  ;;  %v1325_v49 = vsel %vm1319_vm3, %v1316_v47, %v2879_v45  ;;  %v1326_v31 = vsel %vm1319_vm3, %v1317_v27, %v2883_v42  ;;  %v1327_v16 = vsel %vm1319_vm3, %v1318_v28, %v2884_v23  ;;  %v3056_v46 = vld [vmem:[%s4011_s3 + $0x8] sm:$0xff]  }
 0x121   : > { %v1330_v6 = vpack.c.bf16 %v1325_v49, %v1324_v48  ;;  %v1331_v50 = vpack.c.bf16 %v1327_v16, %v1326_v31 }
 0x122   : > { %2534 = vmatpush3.bf16.msra.mxu1 %v3054_v17 }
 0x123   : > { %2527 = vmatprep.mubr.bf16.mxu0 %v1330_v6  ;;  %2535 = vmatprep.subr.bf16.mxu1 %v3055_v41  ;;  %v3057_v6 = vld [vmem:[%s4011_s3] sm:$0xff]  }
 0x124   : > { %2528 = vmatmul.mubr.bf16.gmra.mxu0 %v1331_v50 }
 0x126   : > { %2536 = vmatpush3.bf16.msra.mxu1 %v3055_v41 }
 0x127   : > { %2537 = vmatprep.subr.bf16.mxu1 %v3056_v46 }
 0x12a   : > { %2538 = vmatpush3.bf16.msra.mxu1 %v3056_v46 }
 0x12b   : > { %2539 = vmatprep.subr.bf16.mxu1 %v3057_v6 }
 0x12e   : > { %2540 = vmatpush3.bf16.msra.mxu1 %v3057_v6 }
 0x1c7   : > { %v2525_v51 = vpop.f32.mrf.mxu0 }
 0x1c8   : > { %v1446_v54 = vadd.f32 %v2525_v51, %v3727_v5 }
 0x1c9   : > { %v1437_v55 = vpop.f32.mrf.mxu0 }
 0x1ca   : > { %vm1470_vm4 = vcmp.gt.f32.partialorder %v1446_v54, 0.0  ;;  %v1478_v56 = vmul.f32 0.2, %v1446_v54  ;;  %v1438_v37 = vadd.f32 %v3727_v5, %v1437_v55 }
 0x1cb   : > { %v2526_v43 = vpop.f32.mrf.mxu0 }
 0x1cc   : > { %v1486_v44 = vsel %vm1470_vm4, %v1446_v54, %v1478_v56  ;;  %vm1468_vm13 = vcmp.gt.f32.partialorder %v1438_v37, 0.0  ;;  %v1476_v57 = vmul.f32 0.2, %v1438_v37  ;;  %v1449_v26 = vadd.f32 %v2526_v43, %v3727_v5 }
 0x1cd   : > { %1495 = vst.msk [vmem:[#allocation3 + $0x31] sm:$0xff] %vm382_vm0, %v1486_v44  ;;  %v1440_v58 = vpop.f32.mrf.mxu0 }
 0x1ce   : > { %v1484_v59 = vsel %vm1468_vm13, %v1438_v37, %v1476_v57  ;;  %vm1471_vm14 = vcmp.gt.f32.partialorder %v1449_v26, 0.0  ;;  %v1479_v60 = vmul.f32 0.2, %v1449_v26  ;;  %v1441_v10 = vadd.f32 %v3727_v5, %v1440_v58 }
 0x1cf   : > { %1493 = vst.msk [vmem:[#allocation3 + $0x11] sm:$0xff] %vm382_vm0, %v1484_v59 }
 0x1d0   : > { %v1487_v61 = vsel %vm1471_vm14, %v1449_v26, %v1479_v60  ;;  %vm1469_vm15 = vcmp.gt.f32.partialorder %v1441_v10, 0.0  ;;  %v1477_v62 = vmul.f32 0.2, %v1441_v10 }
 0x1d1   : > { %1496 = vst.msk [vmem:[#allocation3 + $0x41] sm:$0xff] %vm382_vm0, %v1487_v61 }
 0x1d2   : > { %v1485_v1 = vsel %vm1469_vm15, %v1441_v10, %v1477_v62 }
 0x1d3   : > { %1494 = vst.msk [vmem:[#allocation3 + $0x21] sm:$0xff] %vm382_vm0, %v1485_v1 }
 0x1d4   : > { %v3737_v30 = vld [vmem:[#allocation3 + $0x30] sm:$0xff] }
 0x1d5   : > { %v1560_v7 = vld [vmem:[#allocation3 + $0x31] sm:$0xff] }
 0x1d6   : > { %v1535_v2 = vld [vmem:[#allocation3 + $0x11] sm:$0xff] }
 0x1d7   : > { %v2885_v25 = vpack.i.bf16 %v1535_v2, %v1534_v24  ;;  %v1543_v3 = vld [vmem:[#allocation3 + $0x12] sm:$0xff] }
 0x1d8   : > { %v3739_v0 = vld [vmem:[#allocation3 + $0x40] sm:$0xff]  ;;  %v2890_v34 = vpack.i.bf16 %v1543_v3, %v1542_v63  ;;  %v3751_v53 = vld [vmem:[#allocation3 + $0x10] sm:$0xff] }
 0x1d9   : > { %2886 = vrot.lane.b32.xlu0 %v2885_v25, %s3068_s29  ;;  %v2895_v4 = vpack.i.bf16 %v3739_v0, %v3737_v30  ;;  %v3744_v29 = vld [vmem:[#allocation3 + $0x41] sm:$0xff]  ;;  %v1568_v21 = vld [vmem:[#allocation3 + $0x32] sm:$0xff] }
 0x1da   : > { %v3747_v33 = vld [vmem:[#allocation3 + $0x20] sm:$0xff]  ;;  %v2900_v12 = vpack.i.bf16 %v3744_v29, %v1560_v7 }
 0x1db   : > { %2896 = vrot.lane.b32.xlu1 %v2895_v4, %s3069_s30  ;;  %v3753_v13 = vld [vmem:[#allocation3 + $0x42] sm:$0xff]  ;;  %v2920_v15 = vpack.i.bf16 %v3747_v33, %v3751_v53  ;;  %v2935_v28 = vpack.i.bf16 %v3737_v30, %v3747_v33 }
 0x1dc   : > { %v1559_v22 = vld [vmem:[#allocation3 + $0x21] sm:$0xff]  ;;  %v2905_v8 = vpack.i.bf16 %v3753_v13, %v1568_v21 }
 0x1dd   : > { %2891 = vrot.lane.b32.xlu0 %v2890_v34, %s3067_s28  ;;  %v2925_v52 = vpack.i.bf16 %v1559_v22, %v1535_v2  ;;  %v1567_v18 = vld [vmem:[#allocation3 + $0x22] sm:$0xff]  ;;  %v2910_v38 = vpack.i.bf16 %v1560_v7, %v1559_v22  ;;  %v2146_v7 = vld [vmem:[%s4013_s5] sm:$0xf] }
 0x1de   : > { %v2930_v36 = vpack.i.bf16 %v1567_v18, %v1543_v3  ;;  %v2915_v23 = vpack.i.bf16 %v1568_v21, %v1567_v18  ;;  %v1582_v3 = vld [vmem:[#allocation3 + $0x90] sm:$0xff]  ;;  %2560 = vmatprep.subr.msk.bf16.mxu1 %vm1978_vm1, %v2146_v7 }
 0x1df   : > { %2901 = vrot.lane.b32.xlu1 %v2900_v12, %s3070_s7  ;;  %v3829_v12 = vsel %vm1978_vm1, %v2146_v7, 0  ;;  %v1598_v21 = vld [vmem:[#allocation3 + $0x92] sm:$0xff] }
 0x1e1   : > { %2921 = vrot.lane.b32.xlu0 %v2920_v15, %s3069_s30 }
 0x1e3   : > { %2906 = vrot.lane.b32.xlu1 %v2905_v8, %s3071_s8 }
 0x1e4   : > { %v2529_v11 = vpop.f32.mrf.mxu0 }
 0x1e5   : > { %v1462_v19 = vadd.f32 %v2529_v11, %v3727_v5  ;;  %2926 = vrot.lane.b32.xlu0 %v2925_v52, %s3070_s7 }
 0x1e6   : > { %v1453_v20 = vpop.f32.mrf.mxu0 }
 0x1e7   : > { %vm1474_vm2 = vcmp.gt.f32.partialorder %v1462_v19, 0.0  ;;  %v1482_v35 = vmul.f32 0.2, %v1462_v19  ;;  %v1454_v9 = vadd.f32 %v3727_v5, %v1453_v20  ;;  %2911 = vrot.lane.b32.xlu1 %v2910_v38, %s3068_s29 }
 0x1e8   : > { %v2530_v39 = vpop.f32.mrf.mxu0 }
 0x1e9   : > { %v1490_v42 = vsel %vm1474_vm2, %v1462_v19, %v1482_v35  ;;  %vm1472_vm3 = vcmp.gt.f32.partialorder %v1454_v9, 0.0  ;;  %v1480_v45 = vmul.f32 0.2, %v1454_v9  ;;  %v1465_v40 = vadd.f32 %v2530_v39, %v3727_v5  ;;  %2931 = vrot.lane.b32.xlu0 %v2930_v36, %s3071_s8 }
 0x1ea   : > { %1499 = vst.msk [vmem:[#allocation3 + $0x71] sm:$0xff] %vm382_vm0, %v1490_v42  ;;  %v1456_v27 = vpop.f32.mrf.mxu0 }
 0x1eb   : > { %v1488_v47 = vsel %vm1472_vm3, %v1454_v9, %v1480_v45  ;;  %vm1475_vm4 = vcmp.gt.f32.partialorder %v1465_v40, 0.0  ;;  %v1483_v48 = vmul.f32 0.2, %v1465_v40  ;;  %v1457_v49 = vadd.f32 %v3727_v5, %v1456_v27  ;;  %2916 = vrot.lane.b32.xlu1 %v2915_v23, %s3067_s28  ;;  %v1526_v9 = vld [vmem:[#allocation3] sm:$0xff] }
 0x1ec   : > { %1497 = vst.msk [vmem:[#allocation3 + $0x51] sm:$0xff] %vm382_vm0, %v1488_v47 }
 0x1ed   : > { %v1491_v31 = vsel %vm1475_vm4, %v1465_v40, %v1483_v48  ;;  %vm1473_vm13 = vcmp.gt.f32.partialorder %v1457_v49, 0.0  ;;  %v1481_v16 = vmul.f32 0.2, %v1457_v49  ;;  %2936 = vrot.lane.b32.xlu0 %v2935_v28, %s3072_s9 }
 0x1ee   : > { %1500 = vst.msk [vmem:[#allocation3 + $0x81] sm:$0xff] %vm382_vm0, %v1491_v31 }
 0x1ef   : > { %v1489_v50 = vsel %vm1473_vm13, %v1457_v49, %v1481_v16 }
 0x1f0   : > { %1498 = vst.msk [vmem:[#allocation3 + $0x61] sm:$0xff] %vm382_vm0, %v1489_v50 }
 0x1f1   : > { %2941 = vrot.lane.b32.xlu0 %v2910_v38, %s3073_s10  ;;  %v3810_v26 = vld [vmem:[#allocation3 + $0x70] sm:$0xff] }
 0x1f2   : > { %v1564_v61 = vld [vmem:[#allocation3 + $0x71] sm:$0xff] }
 0x1f3   : > { %v3794_v5 = vld [vmem:[#allocation3 + $0x50] sm:$0xff] }
 0x1f4   : > { %v2950_v51 = vpack.i.bf16 %v3794_v5, %v3739_v0  ;;  %v1594_v54 = vld [vmem:[#allocation3 + $0x52] sm:$0xff] }
 0x1f5   : > { %2946 = vrot.lane.b32.xlu0 %v2915_v23, %s3074_s11  ;;  %v1586_v55 = vld [vmem:[#allocation3 + $0x51] sm:$0xff]  ;;  %v2965_v56 = vpack.i.bf16 %v1594_v54, %v3753_v13  ;;  %v1557_v44 = vld [vmem:[#allocation3 + $0x80] sm:$0xff] }
 0x1f6   : > { %2951 = vrot.lane.b32.xlu1 %v2950_v51, %s3072_s9  ;;  %v2955_v37 = vpack.i.bf16 %v1586_v55, %v3744_v29  ;;  %v2975_v58 = vpack.i.bf16 %v1557_v44, %v3810_v26  ;;  %v1565_v60 = vld [vmem:[#allocation3 + $0x81] sm:$0xff]  ;;  %v1572_v25 = vld [vmem:[#allocation3 + $0x72] sm:$0xff]  ;;  %v2990_v29 = vpack.i.bf16 %v1582_v3, %v1557_v44 }
 0x1f7   : > { %v3804_v43 = vld [vmem:[#allocation3 + $0x60] sm:$0xff]  ;;  %v2980_v62 = vpack.i.bf16 %v1565_v60, %v1564_v61  ;;  %v3005_v15 = vpack.i.bf16 %v1590_v14, %v1565_v60 }
 0x1f8   : > { %v3010_v57 = vpack.i.bf16 %v3804_v43, %v3794_v5  ;;  %v1563_v59 = vld [vmem:[#allocation3 + $0x61] sm:$0xff]  ;;  %v3025_v4 = vpack.i.bf16 %v3810_v26, %v3804_v43 }
 0x1f9   : > { %2966 = vrot.lane.b32.xlu0 %v2965_v56, %s3074_s11  ;;  %v3015_v10 = vpack.i.bf16 %v1563_v59, %v1586_v55  ;;  %v1571_v1 = vld [vmem:[#allocation3 + $0x62] sm:$0xff]  ;;  %v3030_v34 = vpack.i.bf16 %v1564_v61, %v1563_v59 }
 0x1fa   : > { %2956 = vrot.lane.b32.xlu1 %v2955_v37, %s3073_s10  ;;  %v1573_v24 = vld [vmem:[#allocation3 + $0x82] sm:$0xff]  ;;  %v3020_v2 = vpack.i.bf16 %v1571_v1, %v1594_v54  ;;  %v3035_v13 = vpack.i.bf16 %v1572_v25, %v1571_v1 }
 0x1fb   : > { %v2985_v63 = vpack.i.bf16 %v1573_v24, %v1572_v25  ;;  %v3040_v22 = vpack.i.bf16 %v1598_v21, %v1573_v24 }
 0x1fd   : > { %2971 = vrot.lane.b32.xlu0 %v2965_v56, %s3067_s28 }
 0x1fe   : > { %2961 = vrot.lane.b32.xlu1 %v2955_v37, %s3068_s29 }
 0x201   : > { %3011 = vrot.lane.b32.xlu0 %v3010_v57, %s3069_s30 }
 0x202   : > { %2976 = vrot.lane.b32.xlu1 %v2975_v58, %s3069_s30 }
 0x205   : > { %3016 = vrot.lane.b32.xlu0 %v3015_v10, %s3070_s7 }
 0x206   : > { %2981 = vrot.lane.b32.xlu1 %v2980_v62, %s3070_s7 }
 0x209   : > { %3021 = vrot.lane.b32.xlu0 %v3020_v2, %s3071_s8 }
 0x20a   : > { %2986 = vrot.lane.b32.xlu1 %v2985_v63, %s3071_s8 }
 0x20d   : > { %3026 = vrot.lane.b32.xlu0 %v3025_v4, %s3072_s9 }
 0x20e   : > { %2991 = vrot.lane.b32.xlu1 %v2990_v29, %s3072_s9 }
 0x211   : > { %3031 = vrot.lane.b32.xlu0 %v3030_v34, %s3073_s10 }
 0x212   : > { %2996 = vrot.lane.b32.xlu1 %v3030_v34, %s3068_s29  ;;  %s2480_s29 = sshll.u32 %s4017_s22, 6 }
 0x213   : > { %s3987_s9 = scalar_lea.vmem %s4014_s6, %s2480_s29 }
 0x215   : > { %3036 = vrot.lane.b32.xlu0 %v3035_v13, %s3074_s11 }
 0x216   : > { %3001 = vrot.lane.b32.xlu1 %v3035_v13, %s3067_s28 }
 0x21a   : > { %3006 = vrot.lane.b32.xlu1 %v3005_v15, %s3073_s10 }
 0x21e   : > { %3041 = vrot.lane.b32.xlu1 %v3040_v22, %s3074_s11 }
 0x24b   : > { %v2887_v32 = vpop.permute.xlu0 %2886 }
 0x24c   : > { %v2889_v20 = vunpack.i.h.bf16 %v2887_v32  ;;  %v2888_v35 = vunpack.i.l.bf16 %v2887_v32 }
 0x24d   : > { %v2897_v8 = vpop.permute.xlu1 %2896 }
 0x24e   : > { %v1855_v27 = vsel %vm382_vm0, %v1526_v9, %v2888_v35  ;;  %v1856_v28 = vsel %vm382_vm0, %v3751_v53, %v2889_v20  ;;  %v2899_v48 = vunpack.i.h.bf16 %v2897_v8  ;;  %v2898_v49 = vunpack.i.l.bf16 %v2897_v8 }
 0x24f   : > { %v2892_v17 = vpop.permute.xlu0 %2891 }
 0x250   : > { %v2894_v46 = vunpack.i.h.bf16 %v2892_v17  ;;  %v2893_v47 = vunpack.i.l.bf16 %v2892_v17 }
 0x251   : > { %v2902_v52 = vpop.permute.xlu1 %2901 }
 0x252   : > { %v1863_v57 = vsel %vm1202_vm5, %v1855_v27, %v2893_v47  ;;  %v1864_v58 = vsel %vm1202_vm5, %v1856_v28, %v2894_v46  ;;  %v2904_v25 = vunpack.i.h.bf16 %v2902_v52  ;;  %v2903_v63 = vunpack.i.l.bf16 %v2902_v52 }
 0x253   : > { %v2922_v11 = vpop.permute.xlu0 %2921 }
 0x254   : > { %v2924_v31 = vunpack.i.h.bf16 %v2922_v11  ;;  %v2923_v16 = vunpack.i.l.bf16 %v2922_v11 }
 0x255   : > { %v3836_v18 = vpop.permute.xlu1 %2906 }
 0x256   : > { %v1871_v10 = vsel %vm1211_vm6, %v1863_v57, %v2923_v16 }
 0x257   : > { %v2927_v41 = vpop.permute.xlu0 %2926 }
 0x258   : > { %v2929_v6 = vunpack.i.h.bf16 %v2927_v41  ;;  %v2928_v50 = vunpack.i.l.bf16 %v2927_v41 }
 0x259   : > { %v2912_v19 = vpop.permute.xlu1 %2911 }
 0x25a   : > { %v2914_v39 = vunpack.i.h.bf16 %v2912_v19  ;;  %v2913_v23 = vunpack.i.l.bf16 %v2912_v19  ;;  %v2909_v19 = vunpack.i.h.bf16 %v3836_v18 }
 0x25b   : > { %v2932_v38 = vpop.permute.xlu0 %2931 }
 0x25c   : > { %v1858_v51 = vsel %vm382_vm0, %v3737_v30, %v2914_v39  ;;  %v1857_v54 = vsel %vm382_vm0, %v3747_v33, %v2913_v23  ;;  %v2934_v55 = vunpack.i.h.bf16 %v2932_v38  ;;  %v2933_v56 = vunpack.i.l.bf16 %v2932_v38 }
 0x25d   : > { %v2917_v36 = vpop.permute.xlu1 %2916  ;;  %v1872_v30 = vsel %vm1211_vm6, %v1864_v58, %v2924_v31  ;;  %v1879_v33 = vsel %vm1220_vm7, %v1871_v10, %v2928_v50  ;;  %v2908_v38 = vunpack.i.l.bf16 %v3836_v18  ;;  %v2449_v50 = vld [vmem:[%s3273_s27 + $0x1] ss:$2 sm:$0xff]  ;;  %v2443_v10 = vld [vmem:[%s3273_s27 + $0x40] ss:$2 sm:$0xff] }
 0x25e   : > { %v2919_v42 = vunpack.i.h.bf16 %v2917_v36  ;;  %v2918_v45 = vunpack.i.l.bf16 %v2917_v36  ;;  %v1880_v1 = vsel %vm1220_vm7, %v1872_v30, %v2929_v6  ;;  %v1887_v3 = vsel %vm1229_vm8, %v1879_v33, %v2933_v56  ;;  %v2047_v6 = vld [vmem:[%s3273_s27] ss:$2 sm:$0xff]  ;;  %v2450_v56 = vld [vmem:[%s3273_s27 + $0x21] ss:$2 sm:$0xff] }
 0x25f   : > { %v2937_v40 = vpop.permute.xlu0 %2936  ;;  %v1888_v4 = vsel %vm1229_vm8, %v1880_v1, %v2934_v55  ;;  %v2442_v55 = vld [vmem:[%s3273_s27 + $0x20] ss:$2 sm:$0xff]  ;;  %v2451_v30 = vld [vmem:[%s3273_s27 + $0x41] ss:$2 sm:$0xff] }
 0x260   : > { %v1865_v37 = vsel %vm1202_vm5, %v1857_v54, %v2918_v45  ;;  %v1866_v53 = vsel %vm1202_vm5, %v1858_v51, %v2919_v42  ;;  %v2939_v59 = vunpack.i.h.bf16 %v2937_v40  ;;  %v2938_v60 = vunpack.i.l.bf16 %v2937_v40  ;;  %v2452_v33 = vld [vmem:[%s3273_s27 + $0x61] ss:$2 sm:$0xff] }
 0x261   : > { %v1873_v24 = vsel %vm1211_vm6, %v1865_v37, %v2898_v49  ;;  %v1874_v2 = vsel %vm1211_vm6, %v1866_v53, %v2899_v48  ;;  %v2078_v37 = vadd.f32 %v2449_v50, %v2047_v6  ;;  %v2457_v53 = vld [vmem:[%s3273_s27 + $0x10] ss:$2 sm:$0xff]  ;;  %v2079_v57 = vadd.f32 %v2450_v56, %v2442_v55 }
 0x262   : > { %v1895_v34 = vsel %vm1238_vm9, %v1887_v3, %v2938_v60  ;;  %v1896_v7 = vsel %vm1238_vm9, %v1888_v4, %v2939_v59  ;;  %v1881_v21 = vsel %vm1220_vm7, %v1873_v24, %v2903_v63  ;;  %v1882_v22 = vsel %vm1220_vm7, %v1874_v2, %v2904_v25  ;;  %v2458_v59 = vld [vmem:[%s3273_s27 + $0x30] ss:$2 sm:$0xff]  ;;  %v2466_v63 = vld [vmem:[%s3273_s27 + $0x31] ss:$2 sm:$0xff] }
 0x263   : > { %v2942_v44 = vpop.permute.xlu0 %2941  ;;  %v1889_v36 = vsel %vm1229_vm8, %v1881_v21, %v2908_v38  ;;  %v1890_v39 = vsel %vm1229_vm8, %v1882_v22, %v2909_v19  ;;  %v2102_v60 = vadd.f32 %v2457_v53, %v2078_v37  ;;  %v2103_v2 = vadd.f32 %v2458_v59, %v2079_v57 }
 0x264   : > { %v2944_v61 = vunpack.i.h.bf16 %v2942_v44  ;;  %v2943_v62 = vunpack.i.l.bf16 %v2942_v44  ;;  %v2080_v3 = vadd.f32 %v2451_v30, %v2443_v10 }
 0x265   : > { %v2127_v21 = vadd.f32 %v2466_v63, %v2103_v2 }
 0x266   : > { %v1903_v32 = vsel %vm1247_vm10, %v1895_v34, %v2943_v62  ;;  %v1904_v8 = vsel %vm1247_vm10, %v1896_v7, %v2944_v61  ;;  %v2465_v61 = vld [vmem:[%s3273_s27 + $0x11] ss:$2 sm:$0xff]  ;;  %v2444_v62 = vld [vmem:[%s3273_s27 + $0x60] ss:$2 sm:$0xff]  ;;  %v2459_v34 = vld [vmem:[%s3273_s27 + $0x50] ss:$2 sm:$0xff] }
 0x267   : > { %v2947_v29 = vpop.permute.xlu0 %2946  ;;  %v2126_v4 = vadd.f32 %v2465_v61, %v2102_v60  ;;  %v2460_v7 = vld [vmem:[%s3273_s27 + $0x70] ss:$2 sm:$0xff] }
 0x268   : > { %v2949_v13 = vunpack.i.h.bf16 %v2947_v29  ;;  %v2948_v14 = vunpack.i.l.bf16 %v2947_v29  ;;  %v2952_v15 = vpop.permute.xlu1 %2951  ;;  %v2081_v29 = vadd.f32 %v2452_v33, %v2444_v62 }
 0x269   : > { %v2954_v17 = vunpack.i.h.bf16 %v2952_v15  ;;  %v2953_v52 = vunpack.i.l.bf16 %v2952_v15  ;;  %v3908_v38 = vmul.f32 0.25, %v2126_v4 }
 0x26a   : > { %v1911_v11 = vsel %vm1256_vm11, %v1903_v32, %v2948_v14  ;;  %v1912_v41 = vsel %vm1256_vm11, %v1904_v8, %v2949_v13 }
 0x26b   : > { %v2967_v20 = vpop.permute.xlu0 %2966  ;;  %v1919_v35 = vpack.c.bf16 %v1912_v41, %v1911_v11  ;;  %v1897_v45 = vsel %vm1238_vm9, %v1889_v36, %v2953_v52  ;;  %v1898_v40 = vsel %vm1238_vm9, %v1890_v39, %v2954_v17  ;;  %v3904_v17 = vadd.f32 %v2459_v34, %v2080_v3  ;;  %v2445_v52 = vld [vmem:[%s3273_s27 + $0x80] ss:$2 sm:$0xff]  ;;  %v2453_v11 = vld [vmem:[%s3273_s27 + $0x81] ss:$2 sm:$0xff] }
 0x26c   : > { %v2957_v9 = vpop.permute.xlu1 %2956  ;;  %v2969_v27 = vunpack.i.h.bf16 %v2967_v20  ;;  %v2968_v18 = vunpack.i.l.bf16 %v2967_v20  ;;  %v3910_v20 = vadd.f32 %v2460_v7, %v2081_v29 }
 0x26d   : > { %v2959_v23 = vunpack.i.h.bf16 %v2957_v9  ;;  %v2958_v42 = vunpack.i.l.bf16 %v2957_v9  ;;  %2541 = vmatprep.mubr.msk.bf16.mxu1 %vm1265_vm12, %v1919_v35  ;;  %v2454_v35 = vld [vmem:[%s3273_s27 + $0xa1] ss:$2 sm:$0xff] }
 0x26f   : > { %v1905_v28 = vsel %vm1247_vm10, %v1897_v45, %v2958_v42  ;;  %v1906_v46 = vsel %vm1247_vm10, %v1898_v40, %v2959_v23  ;;  %v2972_v47 = vpop.permute.xlu0 %2971  ;;  %v3916_v40 = vmul.f32 0.25, %v2127_v21  ;;  %v2461_v21 = vld [vmem:[%s3273_s27 + $0x90] ss:$2 sm:$0xff] }
 0x270   : > { %v2962_v48 = vpop.permute.xlu1 %2961  ;;  %v1913_v49 = vsel %vm1256_vm11, %v1905_v28, %v2968_v18  ;;  %v1914_v31 = vsel %vm1256_vm11, %v1906_v46, %v2969_v27  ;;  %v2974_v22 = vunpack.i.h.bf16 %v2972_v47  ;;  %v2973_v32 = vunpack.i.l.bf16 %v2972_v47 }
 0x271   : > { %v1920_v16 = vpack.c.bf16 %v1914_v31, %v1913_v49  ;;  %v2964_v1 = vunpack.i.h.bf16 %v2962_v48  ;;  %v2082_v27 = vadd.f32 %v2453_v11, %v2445_v52  ;;  %v2467_v11 = vld [vmem:[%s3273_s27 + $0x51] ss:$2 sm:$0xff] }
 0x273   : > { %v3012_v51 = vpop.permute.xlu0 %3011  ;;  %2542 = vmatmul.mubr.msk.bf16.vlgmr.msra.gmra.mxu1 %vm1265_vm12, %v1920_v16  ;;  %v1860_v13 = vsel %vm382_vm0, %v3794_v5, %v2964_v1  ;;  %v2446_v5 = vld [vmem:[%s3273_s27 + $0xa0] ss:$2 sm:$0xff] }
 0x274   : > { %v3879_v54 = vpop.permute.xlu1 %2976  ;;  %2550 = vmatpush3.bf16.msra.mxu1 %v3829_v12  ;;  %v2963_v12 = vunpack.i.l.bf16 %v2962_v48  ;;  %v3014_v41 = vunpack.i.h.bf16 %v3012_v51  ;;  %v3013_v19 = vunpack.i.l.bf16 %v3012_v51  ;;  %v1868_v9 = vsel %vm1202_vm5, %v1860_v13, %v2974_v22  ;;  %v2462_v22 = vld [vmem:[%s3273_s27 + $0xb0] ss:$2 sm:$0xff] }
 0x275   : > { %v2979_v18 = vunpack.i.h.bf16 %v3879_v54  ;;  %v2083_v48 = vadd.f32 %v2454_v35, %v2446_v5  ;;  %v2978_v37 = vunpack.i.l.bf16 %v3879_v54 }
 0x276   : > { %v1859_v14 = vsel %vm382_vm0, %v3739_v0, %v2963_v12  ;;  %v1876_v31 = vsel %vm1211_vm6, %v1868_v9, %v3014_v41  ;;  %v2447_v9 = vld [vmem:[%s3273_s27 + $0xc0] ss:$2 sm:$0xff] }
 0x277   : > { %v3017_v44 = vpop.permute.xlu0 %3016  ;;  %v1867_v0 = vsel %vm1202_vm5, %v1859_v14, %v2973_v32 }
 0x278   : > { %v3885_v58 = vpop.permute.xlu1 %2981  ;;  %v3019_v36 = vunpack.i.h.bf16 %v3017_v44  ;;  %v3018_v39 = vunpack.i.l.bf16 %v3017_v44  ;;  %v1875_v49 = vsel %vm1211_vm6, %v1867_v0, %v3013_v19  ;;  %v2468_v0 = vld [vmem:[%s3273_s27 + $0x71] ss:$2 sm:$0xff] }
 0x279   : > { %v2984_v53 = vunpack.i.h.bf16 %v3885_v58  ;;  %v2983_v4 = vunpack.i.l.bf16 %v3885_v58 }
 0x27a   : > { %v1883_v50 = vsel %vm1220_vm7, %v1875_v49, %v3018_v39  ;;  %v1884_v51 = vsel %vm1220_vm7, %v1876_v31, %v3019_v36  ;;  %v2106_v39 = vadd.f32 %v2461_v21, %v2082_v27  ;;  %v2470_v49 = vld [vmem:[%s3273_s27 + $0xb1] ss:$2 sm:$0xff] }
 0x27b   : > { %v3022_v24 = vpop.permute.xlu0 %3021 }
 0x27c   : > { %v3893_v25 = vpop.permute.xlu1 %2986  ;;  %v3024_v23 = vunpack.i.h.bf16 %v3022_v24  ;;  %v3023_v42 = vunpack.i.l.bf16 %v3022_v24 }
 0x27d   : > { %v2989_v13 = vunpack.i.h.bf16 %v3893_v25  ;;  %v2988_v14 = vunpack.i.l.bf16 %v3893_v25 }
 0x27e   : > { %v1891_v44 = vsel %vm1229_vm8, %v1883_v50, %v3023_v42  ;;  %v1892_v57 = vsel %vm1229_vm8, %v1884_v51, %v3024_v23  ;;  %v2107_v23 = vadd.f32 %v2462_v22, %v2083_v48  ;;  %v2448_v42 = vld [vmem:[%s3273_s27 + $0xe0] ss:$2 sm:$0xff]  ;;  %v2129_v50 = vadd.f32 %v2468_v0, %v3910_v20 }
 0x27f   : > { %v3027_v15 = vpop.permute.xlu0 %3026 }
 0x280   : > { %v3902_v8 = vpop.permute.xlu1 %2991  ;;  %v3029_v28 = vunpack.i.h.bf16 %v3027_v15  ;;  %v3028_v46 = vunpack.i.l.bf16 %v3027_v15  ;;  %v2137_v20 = vmul.f32 0.25, %v2129_v50 }
 0x281   : > { %v2994_v58 = vunpack.i.h.bf16 %v3902_v8  ;;  %v2993_v32 = vunpack.i.l.bf16 %v3902_v8 }
 0x282   : > { %v1899_v60 = vsel %vm1238_vm9, %v1891_v44, %v3028_v46  ;;  %v1900_v10 = vsel %vm1238_vm9, %v1892_v57, %v3029_v28  ;;  %v2128_v46 = vadd.f32 %v2467_v11, %v3904_v17  ;;  %v2463_v44 = vld [vmem:[%s3273_s27 + $0xd0] ss:$2 sm:$0xff] }
 0x283   : > { %v3032_v45 = vpop.permute.xlu0 %3031  ;;  %v2464_v57 = vld [vmem:[%s3273_s27 + $0xf0] ss:$2 sm:$0xff] }
 0x284   : > { %v2997_v47 = vpop.permute.xlu1 %2996  ;;  %v3034_v16 = vunpack.i.h.bf16 %v3032_v45  ;;  %v3033_v6 = vunpack.i.l.bf16 %v3032_v45  ;;  %v2455_v45 = vld [vmem:[%s3273_s27 + $0xc1] ss:$2 sm:$0xff] }
 0x285   : > { %v2999_v55 = vunpack.i.h.bf16 %v2997_v47  ;;  %v2998_v56 = vunpack.i.l.bf16 %v2997_v47  ;;  %v2469_v47 = vld [vmem:[%s3273_s27 + $0x91] ss:$2 sm:$0xff]  ;;  %v2084_v51 = vadd.f32 %v2455_v45, %v2447_v9 }
 0x286   : > { %v1907_v33 = vsel %vm1247_vm10, %v1899_v60, %v3033_v6  ;;  %v1908_v1 = vsel %vm1247_vm10, %v1900_v10, %v3034_v16  ;;  %v2142_v6 = vpack.c.bf16 %v3916_v40, %v3908_v38  ;;  %v2136_v38 = vmul.f32 0.25, %v2128_v46 }
 0x287   : > { %v3037_v59 = vpop.permute.xlu0 %3036  ;;  %v1862_v24 = vsel %vm382_vm0, %v3810_v26, %v2999_v55  ;;  %v1861_v2 = vsel %vm382_vm0, %v3804_v43, %v2998_v56  ;;  %v2108_v40 = vadd.f32 %v2463_v44, %v2084_v51 }
 0x288   : > { %v3039_v30 = vunpack.i.h.bf16 %v3037_v59  ;;  %v3038_v61 = vunpack.i.l.bf16 %v3037_v59  ;;  %v3002_v62 = vpop.permute.xlu1 %3001 }
 0x289   : > { %v3004_v54 = vunpack.i.h.bf16 %v3002_v62  ;;  %v3003_v12 = vunpack.i.l.bf16 %v3002_v62  ;;  %v2472_v62 = vld [vmem:[%s3273_s27 + $0xf1] ss:$2 sm:$0xff] }
 0x28a   : > { %v1915_v63 = vsel %vm1256_vm11, %v1907_v33, %v3038_v61  ;;  %v1916_v3 = vsel %vm1256_vm11, %v1908_v1, %v3039_v30  ;;  %v2471_v61 = vld [vmem:[%s3273_s27 + $0xd1] ss:$2 sm:$0xff]  ;;  %v2143_v33 = vpack.c.bf16 %v2137_v20, %v2136_v38 }
 0x28b   : > { %v1921_v29 = vpack.c.bf16 %v1916_v3, %v1915_v63  ;;  %v1869_v34 = vsel %vm1202_vm5, %v1861_v2, %v3003_v12  ;;  %v1870_v7 = vsel %vm1202_vm5, %v1862_v24, %v3004_v54  ;;  %v2132_v1 = vadd.f32 %v2471_v61, %v2108_v40 }
 0x28c   : > { %v1877_v26 = vsel %vm1211_vm6, %v1869_v34, %v2978_v37  ;;  %v1878_v43 = vsel %vm1211_vm6, %v1870_v7, %v2979_v18  ;;  %v3007_v15 = vpop.permute.xlu1 %3006  ;;  %v2456_v18 = vld [vmem:[%s3273_s27 + $0xe1] ss:$2 sm:$0xff]  ;;  %v2130_v37 = vadd.f32 %v2469_v47, %v2106_v39 }
 0x28d   : > { %v1885_v52 = vsel %vm1220_vm7, %v1877_v26, %v2983_v4  ;;  %v1886_v25 = vsel %vm1220_vm7, %v1878_v43, %v2984_v53  ;;  %2545 = vmatprep.mubr.msk.bf16.mxu1 %vm1265_vm12, %v1921_v29  ;;  %v3009_v41 = vunpack.i.h.bf16 %v3007_v15  ;;  %v3008_v19 = vunpack.i.l.bf16 %v3007_v15 }
 0x28e   : > { %v1893_v5 = vsel %vm1229_vm8, %v1885_v52, %v2988_v14  ;;  %v1894_v35 = vsel %vm1229_vm8, %v1886_v25, %v2989_v13  ;;  %v2085_v55 = vadd.f32 %v2456_v18, %v2448_v42  ;;  %v2131_v53 = vadd.f32 %v2470_v49, %v2107_v23  ;;  %v2432_v14 = vld [vmem:[%s4012_s4] ss:$0 sm:$0xff] }
 0x28f   : > { %v1901_v8 = vsel %vm1238_vm9, %v1893_v5, %v2993_v32  ;;  %v1902_v36 = vsel %vm1238_vm9, %v1894_v35, %v2994_v58  ;;  %v2138_v10 = vmul.f32 0.25, %v2130_v37  ;;  %v2140_v24 = vmul.f32 0.25, %v2132_v1 }
 0x290   : > { %v3042_v28 = vpop.permute.xlu1 %3041  ;;  %v1909_v27 = vsel %vm1247_vm10, %v1901_v8, %v3008_v19  ;;  %v1910_v48 = vsel %vm1247_vm10, %v1902_v36, %v3009_v41  ;;  %v2109_v60 = vadd.f32 %v2464_v57, %v2085_v55  ;;  %v2139_v30 = vmul.f32 0.25, %v2131_v53 }
 0x291   : > { %v3044_v31 = vunpack.i.h.bf16 %v3042_v28  ;;  %v3043_v16 = vunpack.i.l.bf16 %v3042_v28 }
 0x292   : > { %v2133_v54 = vadd.f32 %v2472_v62, %v2109_v60  ;;  %v2144_v12 = vpack.c.bf16 %v2139_v30, %v2138_v10 }
 0x293   : > { %v1917_v56 = vsel %vm1256_vm11, %v1909_v27, %v3043_v16  ;;  %v1918_v17 = vsel %vm1256_vm11, %v1910_v48, %v3044_v31 }
 0x294   : > { %v1922_v59 = vpack.c.bf16 %v1918_v17, %v1917_v56  ;;  %v2141_v2 = vmul.f32 0.25, %v2133_v54 }
 0x296   : > { %2546 = vmatmul.mubr.msk.bf16.gmra.mxu1 %vm1265_vm12, %v1922_v59  ;;  %v2145_v63 = vpack.c.bf16 %v2141_v2, %v2140_v24 }
 0x297   : > { %2551 = vmatprep.mubr.msk.bf16.mxu1 %vm382_vm0, %v2142_v6 }
 0x29e   : > { %2552 = vmatmul.mubr.msk.bf16.vlgmr.msra.gmra.mxu1 %vm382_vm0, %v2143_v33 }
 0x29f   : > { %2555 = vmatprep.mubr.msk.bf16.mxu1 %vm382_vm0, %v2144_v12 }
 0x2a6   : > { %2556 = vmatmul.mubr.msk.bf16.gmra.mxu1 %vm382_vm0, %v2145_v63 }
 0x333   : > { %v2543_v3 = vpop.f32.mrf.mxu1 }
 0x334   : > { %v2025_v15 = vadd.f32 %v2543_v3, %v2432_v14 }
 0x335   : > { %v2016_v4 = vpop.f32.mrf.mxu1 }
 0x336   : > { %v2017_v22 = vadd.f32 %v2432_v14, %v2016_v4 }
 0x337   : > { %v2544_v29 = vpop.f32.mrf.mxu1 }
 0x338   : > { %v2028_v52 = vadd.f32 %v2544_v29, %v2432_v14 }
 0x339   : > { %v2019_v34 = vpop.f32.mrf.mxu1 }
 0x33a   : > { %v2020_v19 = vadd.f32 %v2432_v14, %v2019_v34 }
 0x356   : > { %v2547_v7 = vpop.f32.mrf.mxu1 }
 0x357   : > { %v2041_v9 = vadd.f32 %v2547_v7, %v2432_v14 }
 0x358   : > { %v2032_v13 = vpop.f32.mrf.mxu1 }
 0x359   : > { %v2033_v23 = vadd.f32 %v2432_v14, %v2032_v13 }
 0x35a   : > { %v2548_v26 = vpop.f32.mrf.mxu1 }
 0x35b   : > { %v2044_v28 = vadd.f32 %v2548_v26, %v2432_v14 }
 0x35c   : > { %v2035_v43 = vpop.f32.mrf.mxu1 }
 0x35d   : > { %v2036_v31 = vadd.f32 %v2432_v14, %v2035_v43 }
 0x35e   : > { %v2553_v21 = vpop.f32.mrf.mxu1 }
 0x35f   : > { %v2229_v58 = vadd.f32 %v2553_v21, %v2025_v15 }
 0x360   : > { %v2196_v32 = vpop.f32.mrf.mxu1 }
 0x361   : > { %v2237_v25 = vmul.f32 0.70710677, %v2229_v58  ;;  %v2227_v11 = vadd.f32 %v2196_v32, %v2017_v22 }
 0x362   : > { %v2554_v41 = vpop.f32.mrf.mxu1 }
 0x363   : > { %2245 = vst.msk [vmem:[%s3987_s9 + $0x10] sm:$0xff] %vm1202_vm5, %v2237_v25  ;;  %v2235_v5 = vmul.f32 0.70710677, %v2227_v11  ;;  %v2230_v35 = vadd.f32 %v2554_v41, %v2028_v52 }
 0x364   : > { %v2199_v0 = vpop.f32.mrf.mxu1 }
 0x365   : > { %2243 = vst.msk [vmem:[%s3987_s9] sm:$0xff] %vm1202_vm5, %v2235_v5  ;;  %v2238_v8 = vmul.f32 0.70710677, %v2230_v35  ;;  %v2228_v36 = vadd.f32 %v2199_v0, %v2020_v19 }
 0x366   : > { %v2557_v39 = vpop.f32.mrf.mxu1 }
 0x367   : > { %2246 = vst.msk [vmem:[%s3987_s9 + $0x18] sm:$0xff] %vm1202_vm5, %v2238_v8  ;;  %v2236_v42 = vmul.f32 0.70710677, %v2228_v36  ;;  %v2233_v45 = vadd.f32 %v2557_v39, %v2041_v9 }
 0x368   : > { %v2212_v18 = vpop.f32.mrf.mxu1 }
 0x369   : > { %2244 = vst.msk [vmem:[%s3987_s9 + $0x8] sm:$0xff] %vm1202_vm5, %v2236_v42  ;;  %v2241_v46 = vmul.f32 0.70710677, %v2233_v45  ;;  %v2231_v47 = vadd.f32 %v2212_v18, %v2033_v23 }
 0x36a   : > { %v2558_v49 = vpop.f32.mrf.mxu1 }
 0x36b   : > { %2249 = vst.msk [vmem:[%s3987_s9 + $0x30] sm:$0xff] %vm1202_vm5, %v2241_v46  ;;  %v2239_v16 = vmul.f32 0.70710677, %v2231_v47  ;;  %v2234_v6 = vadd.f32 %v2558_v49, %v2044_v28 }
 0x36c   : > { %v2215_v50 = vpop.f32.mrf.mxu1 }
 0x36d   : > { %2247 = vst.msk [vmem:[%s3987_s9 + $0x20] sm:$0xff] %vm1202_vm5, %v2239_v16  ;;  %v2242_v27 = vmul.f32 0.70710677, %v2234_v6  ;;  %v2232_v48 = vadd.f32 %v2215_v50, %v2036_v31 }
 0x36f   : > { %2250 = vst.msk [vmem:[%s3987_s9 + $0x38] sm:$0xff] %vm1202_vm5, %v2242_v27  ;;  %v2240_v51 = vmul.f32 0.70710677, %v2232_v48 }
 0x371   : > { %2248 = vst.msk [vmem:[%s3987_s9 + $0x28] sm:$0xff] %vm1202_vm5, %v2240_v51 }
 0x372 PF: > { %s16_s21 = sadd.s32 1, %s3064_s21  }
 0x373   : > { %p13_p4 = scmp.ge.s32.totalorder %s16_s21, 4  }
 0x375   :  { %15 = sbr.rel (!%p13_p4) target bundleno = 1 (0x1), region = 236 }

</bundles_post_ra>
